<compile_context>
chip_gen: v5e
topology: v5e:2x2
jax: 0.10.0
libtpu: 0.0.40
codegen_flags: <defaults>
</compile_context>

<pallas_src>
import functools
import math

import jax
import jax.numpy as jnp
from jax.experimental import pallas as pl
from jax.experimental.pallas import tpu as pltpu


def _layer_norm_f32(x, gamma, beta, eps):
    mu = jnp.mean(x, axis=-1, keepdims=True)
    var = jnp.mean((x - mu) ** 2, axis=-1, keepdims=True)
    return (x - mu) * jax.lax.rsqrt(var + eps) * gamma + beta


def _gelu_tanh(x):
    # matches nn.functional.gelu(..., approximate='tanh'), f32 math
    c = math.sqrt(2.0 / math.pi)
    return 0.5 * x * (1.0 + jnp.tanh(c * (x + 0.044715 * x * x * x)))


def siglip_encoder_layer_kernel(
    x_ref,
    g1_ref, b1_ref,
    wqkv_ref, bqkv_ref,
    wo_ref, bo_ref,
    g2_ref, b2_ref,
    w1_ref, bf1_ref,
    w2_ref, bf2_ref,
    o_ref,
    att_scr, h1_scr, h2_scr, acc_scr,
    *, num_heads, head_dim, eps, approx_recip,
):
    f32 = jnp.float32
    bf16 = jnp.bfloat16
    d_model = num_heads * head_dim
    j = pl.program_id(1)  # intermediate-dim (MLP) tile index

    # ---- I-step 0: LayerNorm1 + attention + residual + LayerNorm2 (once / b)
    @pl.when(j == 0)
    def _attention():
        x = x_ref[0].astype(f32)                                   # (N, D) f32
        h = _layer_norm_f32(x, g1_ref[...], b1_ref[...], eps)

        # Fused QKV projection: one K=D matmul on the MXU -> (N, 3D) f32.
        qkv = jnp.dot(h.astype(bf16), wqkv_ref[...],
                      preferred_element_type=f32) + bqkv_ref[...]

        scale = head_dim ** (-0.5)
        # Per-head attention; head outputs are staged into the (N, D) VMEM
        # scratch so the output projection below is a single K=D matmul
        # (instead of num_heads K=head_dim matmuls + f32 accumulation).
        for hh in range(num_heads):            # static unroll (small head count)
            lo = hh * head_dim
            hi = lo + head_dim
            qh = qkv[:, lo:hi]
            kh = qkv[:, d_model + lo:d_model + hi]
            vh = qkv[:, 2 * d_model + lo:2 * d_model + hi]

            # q @ k^T contracting the last dims (no explicit transpose).
            s = jax.lax.dot_general(
                qh.astype(bf16), kh.astype(bf16),
                (((1,), (1,)), ((), ())),
                preferred_element_type=f32) * scale                # (N, N) f32

            # softmax in f32 (v5e-safe); reciprocal optionally on the EUP
            s = s - jnp.max(s, axis=-1, keepdims=True)
            p = jnp.exp(s)
            denom = jnp.sum(p, axis=-1, keepdims=True)
            if approx_recip:
                p = p * pl.reciprocal(denom, approx=True)
            else:
                p = p / denom
            # attention dropout has p = 0.0 in this config -> identity (omitted)

            oh = jnp.dot(p.astype(bf16), vh.astype(bf16),
                         preferred_element_type=f32)                # (N, hd) f32
            att_scr[:, lo:hi] = oh

        # Single fused output projection: full K=D on the MXU.
        att = jnp.dot(att_scr[...].astype(bf16), wo_ref[...],
                      preferred_element_type=f32) + bo_ref[...]     # (N, D) f32

        h1 = att + x                                                # residual 1
        h1_scr[...] = h1
        # LayerNorm 2 cached in bf16 -- it only feeds matmuls.
        h2_scr[...] = _layer_norm_f32(h1, g2_ref[...], b2_ref[...], eps).astype(bf16)
        acc_scr[...] = jnp.zeros_like(acc_scr)

    # ---- MLP, streamed over the intermediate dimension (chunk j) ----
    m = jnp.dot(h2_scr[...], w1_ref[...],
                preferred_element_type=f32) + bf1_ref[...]          # (N, tI) f32
    m = _gelu_tanh(m)
    acc_scr[...] += jnp.dot(m.astype(bf16), w2_ref[...],
                            preferred_element_type=f32)             # (N, D) f32

    @pl.when(j == pl.num_programs(1) - 1)
    def _finalize():
        # fc2 bias + second residual, written once per batch element.
        o_ref[0] = (acc_scr[...] + bf2_ref[...] + h1_scr[...]).astype(o_ref.dtype)


def _pick_mlp_tile(intermediate):
    for t in (1024, 512, 256, 128):
        if intermediate % t == 0:
            return t
    return intermediate


def _vmem_limit_bytes():
    try:
        cap = int(pltpu.get_tpu_info().vmem_capacity_bytes)
    except Exception:
        cap = 64 * 1024 * 1024  # conservative (v7x-sized) fallback
    # Leave ~16 MiB headroom for Mosaic internal scratch / pipeline buffers and
    # never request more than ~100 MiB even on 128 MiB parts.
    return max(32 * 1024 * 1024, min(cap - 16 * 1024 * 1024, 100 * 1024 * 1024))


def siglip_encoder_layer(x, params, *, num_heads, eps, mlp_tile=None,
                         approx_softmax_recip=True):
    """x: (B, N, D) f32.

    params (weights pre-transposed to (in, out); matmul weights in bf16):
      (g1, b1, wqkv, bqkv, wo, bo, g2, b2, w1, bf1, w2, bf2)
    """
    B, N, D = x.shape
    assert D % num_heads == 0
    head_dim = D // num_heads
    (g1, b1, wqkv, bqkv, wo, bo, g2, b2, w1, bf1, w2, bf2) = params
    I = w1.shape[1]
    tI = mlp_tile if mlp_tile is not None else _pick_mlp_tile(I)
    assert I % tI == 0
    n_i = I // tI

    kernel = functools.partial(
        siglip_encoder_layer_kernel,
        num_heads=num_heads, head_dim=head_dim, eps=eps,
        approx_recip=approx_softmax_recip,
    )

    inv = lambda b, j: (0, 0)  # grid-invariant params: fetched once
    in_specs = [
        pl.BlockSpec((1, N, D), lambda b, j: (b, 0, 0)),   # x (per batch element)
        pl.BlockSpec(g1.shape, inv), pl.BlockSpec(b1.shape, inv),
        pl.BlockSpec(wqkv.shape, inv), pl.BlockSpec(bqkv.shape, inv),
        pl.BlockSpec(wo.shape, inv), pl.BlockSpec(bo.shape, inv),
        pl.BlockSpec(g2.shape, inv), pl.BlockSpec(b2.shape, inv),
        pl.BlockSpec((D, tI), lambda b, j: (0, j)),        # w1, streamed over I
        pl.BlockSpec((1, tI), lambda b, j: (0, j)),        # fc1 bias, per chunk
        pl.BlockSpec((tI, D), lambda b, j: (j, 0)),        # w2, streamed over I
        pl.BlockSpec(bf2.shape, inv),                      # fc2 bias
    ]

    # Advisory cost estimate for the XLA scheduler.
    flops = int(B * (2 * N * D * (3 * D)      # fused QKV
                     + 4 * N * N * D          # q@k^T and p@v over all heads
                     + 2 * N * D * D          # out projection
                     + 4 * N * D * I))        # fc1 + fc2
    transcendentals = int(B * (num_heads * N * N + N * I))
    bytes_accessed = int(2 * x.size * x.dtype.itemsize
                         + sum(int(p.size) * p.dtype.itemsize for p in params))
    cost = pl.CostEstimate(flops=flops, transcendentals=transcendentals,
                           bytes_accessed=bytes_accessed)

    return pl.pallas_call(
        kernel,
        out_shape=jax.ShapeDtypeStruct((B, N, D), x.dtype),
        grid_spec=pltpu.PrefetchScalarGridSpec(
            num_scalar_prefetch=0,
            grid=(B, n_i),
            in_specs=in_specs,
            out_specs=pl.BlockSpec((1, N, D), lambda b, j: (b, 0, 0)),
            scratch_shapes=[
                pltpu.VMEM((N, D), jnp.float32),   # staged per-head attn outputs
                pltpu.VMEM((N, D), jnp.float32),   # h1: post-attention residual
                pltpu.VMEM((N, D), jnp.bfloat16),  # LN2(h1), matmul-ready
                pltpu.VMEM((N, D), jnp.float32),   # fc2 accumulator
            ],
        ),
        compiler_params=pltpu.CompilerParams(
            dimension_semantics=("parallel", "arbitrary"),
            vmem_limit_bytes=_vmem_limit_bytes(),
        ),
        cost_estimate=cost,
    )(x, *params)


def ref_encoder_layer(x, params, *, num_heads, eps):
    """Pure-JAX reference mirroring the PyTorch forward and the kernel's
    precision policy (bf16 matmul inputs, f32 accumulation/elementwise).
    For num_heads > 1 this is the *corrected* multi-head reference (the
    PyTorch module's reshape only supports a single head)."""
    (g1, b1, wqkv, bqkv, wo, bo, g2, b2, w1, bf1, w2, bf2) = params
    B, N, D = x.shape
    hd = D // num_heads
    f32, bf16 = jnp.float32, jnp.bfloat16

    def ln(t, g, b):
        mu = jnp.mean(t, -1, keepdims=True)
        var = jnp.mean((t - mu) ** 2, -1, keepdims=True)
        return (t - mu) * jax.lax.rsqrt(var + eps) * g + b

    x = x.astype(f32)
    h = ln(x, g1, b1)
    qkv = jnp.dot(h.astype(bf16), wqkv, preferred_element_type=f32) + bqkv
    q, k, v = qkv[..., :D], qkv[..., D:2 * D], qkv[..., 2 * D:]
    q = q.reshape(B, N, num_heads, hd).transpose(0, 2, 1, 3)
    k = k.reshape(B, N, num_heads, hd).transpose(0, 2, 1, 3)
    v = v.reshape(B, N, num_heads, hd).transpose(0, 2, 1, 3)
    s = jnp.einsum("bhqd,bhkd->bhqk", q.astype(bf16), k.astype(bf16),
                   preferred_element_type=f32) * (hd ** -0.5)
    p = jax.nn.softmax(s, axis=-1)
    att = jnp.einsum("bhqk,bhkd->bhqd", p.astype(bf16), v.astype(bf16),
                     preferred_element_type=f32)
    att = att.transpose(0, 2, 1, 3).reshape(B, N, D)
    att = jnp.dot(att.astype(bf16), wo, preferred_element_type=f32) + bo
    h1 = att + x
    h2 = ln(h1, g2, b2)
    m = jnp.dot(h2.astype(bf16), w1, preferred_element_type=f32) + bf1
    m = _gelu_tanh(m)
    m = jnp.dot(m.astype(bf16), w2, preferred_element_type=f32) + bf2
    return m + h1


if __name__ == "__main__":
    # Small but lane/sublane-friendly config: D multiple of 128, N multiple of 8.
    B, N, D, I = 2, 64, 128, 256
    NUM_HEADS = 1  # PyTorch reference reshape only supports 1 head (see NOTE)
    EPS = 1e-6

    key = jax.random.PRNGKey(0)
    ks = jax.random.split(key, 16)

    def lin(kw, kb, fan_in, fan_out):
        w = jax.random.normal(kw, (fan_in, fan_out), jnp.float32) * 0.05
        b = jax.random.normal(kb, (1, fan_out), jnp.float32) * 0.05
        return w, b

    x = jax.random.normal(ks[0], (B, N, D), jnp.float32)

    g1 = jnp.ones((1, D), jnp.float32)
    b1 = jnp.zeros((1, D), jnp.float32)
    g2 = jnp.ones((1, D), jnp.float32)
    b2 = jnp.zeros((1, D), jnp.float32)
    wq, bq = lin(ks[1], ks[2], D, D)
    wk, bk = lin(ks[3], ks[4], D, D)
    wv, bv = lin(ks[5], ks[6], D, D)
    wo, bo = lin(ks[7], ks[8], D, D)
    w1, bf1 = lin(ks[9], ks[10], D, I)
    w2, bf2 = lin(ks[11], ks[12], I, D)

    # Fuse QKV and cast matmul weights to bf16 in the wrapper; biases / LN
    # params stay f32 (f32 accumulation + f32 elementwise in the kernel).
    wqkv = jnp.concatenate([wq, wk, wv], axis=1).astype(jnp.bfloat16)  # (D, 3D)
    bqkv = jnp.concatenate([bq, bk, bv], axis=1)                        # (1, 3D)
    params = (g1, b1, wqkv, bqkv,
              wo.astype(jnp.bfloat16), bo,
              g2, b2,
              w1.astype(jnp.bfloat16), bf1,
              w2.astype(jnp.bfloat16), bf2)

    # mlp_tile=128 -> 2 intermediate-dim grid steps, exercising the streamed
    # MLP / accumulator path even at these small demo shapes.
    run = functools.partial(siglip_encoder_layer, eps=EPS, mlp_tile=128)

    # --- primary check: num_heads == 1 (the only case the PyTorch module supports)
    out = run(x, params, num_heads=NUM_HEADS)
    out = jax.block_until_ready(out)
    ref = ref_encoder_layer(x, params, num_heads=NUM_HEADS, eps=EPS)
    if not bool(jnp.allclose(out, ref, rtol=1e-2, atol=1e-2)):
        raise AssertionError("Pallas kernel output does not match JAX reference (1 head)")

    # --- secondary check: general multi-head path vs corrected multi-head reference
    out2 = run(x, params, num_heads=2)
    out2 = jax.block_until_ready(out2)
    ref2 = ref_encoder_layer(x, params, num_heads=2, eps=EPS)
    if not bool(jnp.allclose(out2, ref2, rtol=1e-2, atol=1e-2)):
        raise AssertionError("Pallas kernel output does not match JAX reference (2 heads)")

    print("KERNEL_OK")
</pallas_src>

<mosaic_0001>
module attributes {stable_mosaic.version = 11 : i64} {
  func.func @siglip_encoder_layer_kernel(%arg0: i32, %arg1: i32, %arg2: memref<1x64x128xf32, #tpu.memory_space<vmem>>, %arg3: memref<1x128xf32, #tpu.memory_space<vmem>>, %arg4: memref<1x128xf32, #tpu.memory_space<vmem>>, %arg5: memref<128x384xbf16, #tpu.memory_space<vmem>>, %arg6: memref<1x384xf32, #tpu.memory_space<vmem>>, %arg7: memref<128x128xbf16, #tpu.memory_space<vmem>>, %arg8: memref<1x128xf32, #tpu.memory_space<vmem>>, %arg9: memref<1x128xf32, #tpu.memory_space<vmem>>, %arg10: memref<1x128xf32, #tpu.memory_space<vmem>>, %arg11: memref<128x128xbf16, #tpu.memory_space<vmem>>, %arg12: memref<1x128xf32, #tpu.memory_space<vmem>>, %arg13: memref<128x128xbf16, #tpu.memory_space<vmem>>, %arg14: memref<1x128xf32, #tpu.memory_space<vmem>>, %arg15: memref<1x64x128xf32, #tpu.memory_space<vmem>>, %arg16: memref<64x128xf32, #tpu.memory_space<vmem>>, %arg17: memref<64x128xf32, #tpu.memory_space<vmem>>, %arg18: memref<64x128xbf16, #tpu.memory_space<vmem>>, %arg19: memref<64x128xf32, #tpu.memory_space<vmem>>) attributes {dimension_semantics = [#tpu.dimension_semantics<parallel>, #tpu.dimension_semantics<arbitrary>], iteration_bounds = array<i64: 2, 2>, scalar_prefetch = 0 : i64, scratch_operands = 4 : i64, tpu.core_type = #tpu.core_type<tc>, window_params = [{transform_indices = @transform_0, window_bounds = array<i64: 1, 64, 128>}, {pipeline_mode = #tpu.pipeline_mode<synchronous>, transform_indices = @transform_1, window_bounds = array<i64: 1, 128>}, {pipeline_mode = #tpu.pipeline_mode<synchronous>, transform_indices = @transform_2, window_bounds = array<i64: 1, 128>}, {pipeline_mode = #tpu.pipeline_mode<synchronous>, transform_indices = @transform_3, window_bounds = array<i64: 128, 384>}, {pipeline_mode = #tpu.pipeline_mode<synchronous>, transform_indices = @transform_4, window_bounds = array<i64: 1, 384>}, {pipeline_mode = #tpu.pipeline_mode<synchronous>, transform_indices = @transform_5, window_bounds = array<i64: 128, 128>}, {pipeline_mode = #tpu.pipeline_mode<synchronous>, transform_indices = @transform_6, window_bounds = array<i64: 1, 128>}, {pipeline_mode = #tpu.pipeline_mode<synchronous>, transform_indices = @transform_7, window_bounds = array<i64: 1, 128>}, {pipeline_mode = #tpu.pipeline_mode<synchronous>, transform_indices = @transform_8, window_bounds = array<i64: 1, 128>}, {transform_indices = @transform_9, window_bounds = array<i64: 128, 128>}, {transform_indices = @transform_10, window_bounds = array<i64: 1, 128>}, {transform_indices = @transform_11, window_bounds = array<i64: 128, 128>}, {pipeline_mode = #tpu.pipeline_mode<synchronous>, transform_indices = @transform_12, window_bounds = array<i64: 1, 128>}, {transform_indices = @transform_13, window_bounds = array<i64: 1, 64, 128>}]} {
    %c0_i32 = arith.constant 0 : i32
    %0 = arith.cmpi eq, %arg1, %c0_i32 : i32
    %1 = arith.extui %0 : i1 to i32
    %c0_i32_0 = arith.constant 0 : i32
    %2 = arith.cmpi ne, %1, %c0_i32_0 : i32
    scf.if %2 {
      %c0_18 = arith.constant 0 : index
      %c0_19 = arith.constant 0 : index
      %c0_20 = arith.constant 0 : index
      %31 = vector.load %arg2[%c0_18, %c0_19, %c0_20] : memref<1x64x128xf32, #tpu.memory_space<vmem>>, vector<1x64x128xf32>
      %32 = vector.shape_cast %31 : vector<1x64x128xf32> to vector<64x128xf32>
      %c0_21 = arith.constant 0 : index
      %c0_22 = arith.constant 0 : index
      %33 = vector.load %arg3[%c0_21, %c0_22] : memref<1x128xf32, #tpu.memory_space<vmem>>, vector<1x128xf32>
      %c0_23 = arith.constant 0 : index
      %c0_24 = arith.constant 0 : index
      %34 = vector.load %arg4[%c0_23, %c0_24] : memref<1x128xf32, #tpu.memory_space<vmem>>, vector<1x128xf32>
      %cst_25 = arith.constant dense<0.000000e+00> : vector<64xf32>
      %35 = vector.multi_reduction <add>, %32, %cst_25 [1] : vector<64x128xf32> to vector<64xf32>
      %36 = vector.shape_cast %35 : vector<64xf32> to vector<64x1xf32>
      %cst_26 = arith.constant 1.280000e+02 : f32
      %37 = vector.broadcast %cst_26 : f32 to vector<64x1xf32>
      %38 = arith.divf %36, %37 : vector<64x1xf32>
      %39 = vector.broadcast %38 : vector<64x1xf32> to vector<64x128xf32>
      %40 = arith.subf %32, %39 : vector<64x128xf32>
      %41 = arith.mulf %40, %40 : vector<64x128xf32>
      %cst_27 = arith.constant dense<0.000000e+00> : vector<64xf32>
      %42 = vector.multi_reduction <add>, %41, %cst_27 [1] : vector<64x128xf32> to vector<64xf32>
      %43 = vector.shape_cast %42 : vector<64xf32> to vector<64x1xf32>
      %cst_28 = arith.constant 1.280000e+02 : f32
      %44 = vector.broadcast %cst_28 : f32 to vector<64x1xf32>
      %45 = arith.divf %43, %44 : vector<64x1xf32>
      %46 = vector.broadcast %38 : vector<64x1xf32> to vector<64x128xf32>
      %47 = arith.subf %32, %46 : vector<64x128xf32>
      %cst_29 = arith.constant 9.99999997E-7 : f32
      %48 = vector.broadcast %cst_29 : f32 to vector<64x1xf32>
      %49 = arith.addf %45, %48 : vector<64x1xf32>
      %50 = math.rsqrt %49 : vector<64x1xf32>
      %51 = vector.broadcast %50 : vector<64x1xf32> to vector<64x128xf32>
      %52 = arith.mulf %47, %51 : vector<64x128xf32>
      %53 = vector.broadcast %33 : vector<1x128xf32> to vector<64x128xf32>
      %54 = arith.mulf %52, %53 : vector<64x128xf32>
      %55 = vector.broadcast %34 : vector<1x128xf32> to vector<64x128xf32>
      %56 = arith.addf %54, %55 : vector<64x128xf32>
      %57 = arith.truncf %56 : vector<64x128xf32> to vector<64x128xbf16>
      %c0_30 = arith.constant 0 : index
      %c0_31 = arith.constant 0 : index
      %58 = vector.load %arg5[%c0_30, %c0_31] : memref<128x384xbf16, #tpu.memory_space<vmem>>, vector<128x384xbf16>
      %cst_32 = arith.constant dense<0.000000e+00> : vector<64x384xf32>
      %59 = tpu.matmul %57, %58, %cst_32 {dimension_numbers = #tpu.dot_dimension_numbers<[1], [0], [0], [1], [0, 0, 1, 1], [], []>} : vector<64x128xbf16>, vector<128x384xbf16>, vector<64x384xf32> -> vector<64x384xf32>
      %c0_33 = arith.constant 0 : index
      %c0_34 = arith.constant 0 : index
      %60 = vector.load %arg6[%c0_33, %c0_34] : memref<1x384xf32, #tpu.memory_space<vmem>>, vector<1x384xf32>
      %61 = vector.broadcast %60 : vector<1x384xf32> to vector<64x384xf32>
      %62 = arith.addf %59, %61 : vector<64x384xf32>
      %63 = vector.extract_strided_slice %62 {offsets = [0, 0], sizes = [64, 128], strides = [1, 1]} : vector<64x384xf32> to vector<64x128xf32>
      %64 = vector.extract_strided_slice %62 {offsets = [0, 128], sizes = [64, 128], strides = [1, 1]} : vector<64x384xf32> to vector<64x128xf32>
      %65 = vector.extract_strided_slice %62 {offsets = [0, 256], sizes = [64, 128], strides = [1, 1]} : vector<64x384xf32> to vector<64x128xf32>
      %66 = arith.truncf %63 : vector<64x128xf32> to vector<64x128xbf16>
      %67 = arith.truncf %64 : vector<64x128xf32> to vector<64x128xbf16>
      %cst_35 = arith.constant dense<0.000000e+00> : vector<64x64xf32>
      %68 = tpu.matmul %66, %67, %cst_35 {dimension_numbers = #tpu.dot_dimension_numbers<[1], [1], [0], [0], [0, 0, 1, 0], [], []>} : vector<64x128xbf16>, vector<64x128xbf16>, vector<64x64xf32> -> vector<64x64xf32>
      %cst_36 = arith.constant 0.0883883461 : f32
      %69 = vector.broadcast %cst_36 : f32 to vector<64x64xf32>
      %70 = arith.mulf %68, %69 : vector<64x64xf32>
      %cst_37 = arith.constant dense<0xFF800000> : vector<64xf32>
      %71 = vector.multi_reduction <maximumf>, %70, %cst_37 [1] : vector<64x64xf32> to vector<64xf32>
      %72 = vector.shape_cast %71 : vector<64xf32> to vector<64x1xf32>
      %73 = vector.broadcast %72 : vector<64x1xf32> to vector<64x64xf32>
      %74 = arith.subf %70, %73 : vector<64x64xf32>
      %75 = math.exp %74 : vector<64x64xf32>
      %cst_38 = arith.constant dense<0.000000e+00> : vector<64xf32>
      %76 = vector.multi_reduction <add>, %75, %cst_38 [1] : vector<64x64xf32> to vector<64xf32>
      %77 = vector.shape_cast %76 : vector<64xf32> to vector<64x1xf32>
      %78 = tpu.reciprocal %77 {approx = true} : vector<64x1xf32> -> vector<64x1xf32>
      %79 = vector.broadcast %78 : vector<64x1xf32> to vector<64x64xf32>
      %80 = arith.mulf %75, %79 : vector<64x64xf32>
      %81 = arith.truncf %80 : vector<64x64xf32> to vector<64x64xbf16>
      %82 = arith.truncf %65 : vector<64x128xf32> to vector<64x128xbf16>
      %cst_39 = arith.constant dense<0.000000e+00> : vector<64x128xf32>
      %83 = tpu.matmul %81, %82, %cst_39 {dimension_numbers = #tpu.dot_dimension_numbers<[1], [0], [0], [1], [0, 0, 1, 1], [], []>} : vector<64x64xbf16>, vector<64x128xbf16>, vector<64x128xf32> -> vector<64x128xf32>
      %c0_40 = arith.constant 0 : index
      %c0_41 = arith.constant 0 : index
      %84 = vector.load %arg16[%c0_40, %c0_41] : memref<64x128xf32, #tpu.memory_space<vmem>>, vector<64x128xf32>
      tpu.vector_store %arg16[%c0_40, %c0_41], %83 {strides = array<i32>} : memref<64x128xf32, #tpu.memory_space<vmem>>, vector<64x128xf32>,
      %c0_42 = arith.constant 0 : index
      %c0_43 = arith.constant 0 : index
      %85 = vector.load %arg16[%c0_42, %c0_43] : memref<64x128xf32, #tpu.memory_space<vmem>>, vector<64x128xf32>
      %86 = arith.truncf %85 : vector<64x128xf32> to vector<64x128xbf16>
      %c0_44 = arith.constant 0 : index
      %c0_45 = arith.constant 0 : index
      %87 = vector.load %arg7[%c0_44, %c0_45] : memref<128x128xbf16, #tpu.memory_space<vmem>>, vector<128x128xbf16>
      %cst_46 = arith.constant dense<0.000000e+00> : vector<64x128xf32>
      %88 = tpu.matmul %86, %87, %cst_46 {dimension_numbers = #tpu.dot_dimension_numbers<[1], [0], [0], [1], [0, 0, 1, 1], [], []>} : vector<64x128xbf16>, vector<128x128xbf16>, vector<64x128xf32> -> vector<64x128xf32>
      %c0_47 = arith.constant 0 : index
      %c0_48 = arith.constant 0 : index
      %89 = vector.load %arg8[%c0_47, %c0_48] : memref<1x128xf32, #tpu.memory_space<vmem>>, vector<1x128xf32>
      %90 = vector.broadcast %89 : vector<1x128xf32> to vector<64x128xf32>
      %91 = arith.addf %88, %90 : vector<64x128xf32>
      %92 = arith.addf %91, %32 : vector<64x128xf32>
      %c0_49 = arith.constant 0 : index
      %c0_50 = arith.constant 0 : index
      %93 = vector.load %arg17[%c0_49, %c0_50] : memref<64x128xf32, #tpu.memory_space<vmem>>, vector<64x128xf32>
      tpu.vector_store %arg17[%c0_49, %c0_50], %92 {strides = array<i32>} : memref<64x128xf32, #tpu.memory_space<vmem>>, vector<64x128xf32>,
      %c0_51 = arith.constant 0 : index
      %c0_52 = arith.constant 0 : index
      %94 = vector.load %arg9[%c0_51, %c0_52] : memref<1x128xf32, #tpu.memory_space<vmem>>, vector<1x128xf32>
      %c0_53 = arith.constant 0 : index
      %c0_54 = arith.constant 0 : index
      %95 = vector.load %arg10[%c0_53, %c0_54] : memref<1x128xf32, #tpu.memory_space<vmem>>, vector<1x128xf32>
      %cst_55 = arith.constant dense<0.000000e+00> : vector<64xf32>
      %96 = vector.multi_reduction <add>, %92, %cst_55 [1] : vector<64x128xf32> to vector<64xf32>
      %97 = vector.shape_cast %96 : vector<64xf32> to vector<64x1xf32>
      %cst_56 = arith.constant 1.280000e+02 : f32
      %98 = vector.broadcast %cst_56 : f32 to vector<64x1xf32>
      %99 = arith.divf %97, %98 : vector<64x1xf32>
      %100 = vector.broadcast %99 : vector<64x1xf32> to vector<64x128xf32>
      %101 = arith.subf %92, %100 : vector<64x128xf32>
      %102 = arith.mulf %101, %101 : vector<64x128xf32>
      %cst_57 = arith.constant dense<0.000000e+00> : vector<64xf32>
      %103 = vector.multi_reduction <add>, %102, %cst_57 [1] : vector<64x128xf32> to vector<64xf32>
      %104 = vector.shape_cast %103 : vector<64xf32> to vector<64x1xf32>
      %cst_58 = arith.constant 1.280000e+02 : f32
      %105 = vector.broadcast %cst_58 : f32 to vector<64x1xf32>
      %106 = arith.divf %104, %105 : vector<64x1xf32>
      %107 = vector.broadcast %99 : vector<64x1xf32> to vector<64x128xf32>
      %108 = arith.subf %92, %107 : vector<64x128xf32>
      %cst_59 = arith.constant 9.99999997E-7 : f32
      %109 = vector.broadcast %cst_59 : f32 to vector<64x1xf32>
      %110 = arith.addf %106, %109 : vector<64x1xf32>
      %111 = math.rsqrt %110 : vector<64x1xf32>
      %112 = vector.broadcast %111 : vector<64x1xf32> to vector<64x128xf32>
      %113 = arith.mulf %108, %112 : vector<64x128xf32>
      %114 = vector.broadcast %94 : vector<1x128xf32> to vector<64x128xf32>
      %115 = arith.mulf %113, %114 : vector<64x128xf32>
      %116 = vector.broadcast %95 : vector<1x128xf32> to vector<64x128xf32>
      %117 = arith.addf %115, %116 : vector<64x128xf32>
      %118 = arith.truncf %117 : vector<64x128xf32> to vector<64x128xbf16>
      %c0_60 = arith.constant 0 : index
      %c0_61 = arith.constant 0 : index
      %119 = vector.load %arg18[%c0_60, %c0_61] : memref<64x128xbf16, #tpu.memory_space<vmem>>, vector<64x128xbf16>
      tpu.vector_store %arg18[%c0_60, %c0_61], %118 {strides = array<i32>} : memref<64x128xbf16, #tpu.memory_space<vmem>>, vector<64x128xbf16>,
      %cst_62 = arith.constant 0.000000e+00 : f32
      %120 = vector.broadcast %cst_62 : f32 to vector<64x128xf32>
      %c0_63 = arith.constant 0 : index
      %c0_64 = arith.constant 0 : index
      %121 = vector.load %arg19[%c0_63, %c0_64] : memref<64x128xf32, #tpu.memory_space<vmem>>, vector<64x128xf32>
      tpu.vector_store %arg19[%c0_63, %c0_64], %120 {strides = array<i32>} : memref<64x128xf32, #tpu.memory_space<vmem>>, vector<64x128xf32>,
    } else {
    }
    %c0 = arith.constant 0 : index
    %c0_1 = arith.constant 0 : index
    %3 = vector.load %arg18[%c0, %c0_1] : memref<64x128xbf16, #tpu.memory_space<vmem>>, vector<64x128xbf16>
    %c0_2 = arith.constant 0 : index
    %c0_3 = arith.constant 0 : index
    %4 = vector.load %arg11[%c0_2, %c0_3] : memref<128x128xbf16, #tpu.memory_space<vmem>>, vector<128x128xbf16>
    %cst = arith.constant dense<0.000000e+00> : vector<64x128xf32>
    %5 = tpu.matmul %3, %4, %cst {dimension_numbers = #tpu.dot_dimension_numbers<[1], [0], [0], [1], [0, 0, 1, 1], [], []>} : vector<64x128xbf16>, vector<128x128xbf16>, vector<64x128xf32> -> vector<64x128xf32>
    %c0_4 = arith.constant 0 : index
    %c0_5 = arith.constant 0 : index
    %6 = vector.load %arg12[%c0_4, %c0_5] : memref<1x128xf32, #tpu.memory_space<vmem>>, vector<1x128xf32>
    %7 = vector.broadcast %6 : vector<1x128xf32> to vector<64x128xf32>
    %8 = arith.addf %5, %7 : vector<64x128xf32>
    %cst_6 = arith.constant 5.000000e-01 : f32
    %9 = vector.broadcast %cst_6 : f32 to vector<64x128xf32>
    %10 = arith.mulf %9, %8 : vector<64x128xf32>
    %cst_7 = arith.constant 4.471500e-02 : f32
    %11 = vector.broadcast %cst_7 : f32 to vector<64x128xf32>
    %12 = arith.mulf %11, %8 : vector<64x128xf32>
    %13 = arith.mulf %12, %8 : vector<64x128xf32>
    %14 = arith.mulf %13, %8 : vector<64x128xf32>
    %15 = arith.addf %8, %14 : vector<64x128xf32>
    %cst_8 = arith.constant 0.797884583 : f32
    %16 = vector.broadcast %cst_8 : f32 to vector<64x128xf32>
    %17 = arith.mulf %16, %15 : vector<64x128xf32>
    %18 = math.tanh %17 : vector<64x128xf32>
    %cst_9 = arith.constant 1.000000e+00 : f32
    %19 = vector.broadcast %cst_9 : f32 to vector<64x128xf32>
    %20 = arith.addf %19, %18 : vector<64x128xf32>
    %21 = arith.mulf %10, %20 : vector<64x128xf32>
    %c0_10 = arith.constant 0 : index
    %c0_11 = arith.constant 0 : index
    %22 = vector.load %arg19[%c0_10, %c0_11] : memref<64x128xf32, #tpu.memory_space<vmem>>, vector<64x128xf32>
    %23 = arith.truncf %21 : vector<64x128xf32> to vector<64x128xbf16>
    %c0_12 = arith.constant 0 : index
    %c0_13 = arith.constant 0 : index
    %24 = vector.load %arg13[%c0_12, %c0_13] : memref<128x128xbf16, #tpu.memory_space<vmem>>, vector<128x128xbf16>
    %cst_14 = arith.constant dense<0.000000e+00> : vector<64x128xf32>
    %25 = tpu.matmul %23, %24, %cst_14 {dimension_numbers = #tpu.dot_dimension_numbers<[1], [0], [0], [1], [0, 0, 1, 1], [], []>} : vector<64x128xbf16>, vector<128x128xbf16>, vector<64x128xf32> -> vector<64x128xf32>
    %26 = arith.addf %22, %25 : vector<64x128xf32>
    %c0_15 = arith.constant 0 : index
    %c0_16 = arith.constant 0 : index
    %27 = vector.load %arg19[%c0_15, %c0_16] : memref<64x128xf32, #tpu.memory_space<vmem>>, vector<64x128xf32>
    tpu.vector_store %arg19[%c0_15, %c0_16], %26 {strides = array<i32>} : memref<64x128xf32, #tpu.memory_space<vmem>>, vector<64x128xf32>,
    %c1_i32 = arith.constant 1 : i32
    %28 = arith.cmpi eq, %arg1, %c1_i32 : i32
    %29 = arith.extui %28 : i1 to i32
    %c0_i32_17 = arith.constant 0 : i32
    %30 = arith.cmpi ne, %29, %c0_i32_17 : i32
    scf.if %30 {
      %c0_18 = arith.constant 0 : index
      %c0_19 = arith.constant 0 : index
      %31 = vector.load %arg19[%c0_18, %c0_19] : memref<64x128xf32, #tpu.memory_space<vmem>>, vector<64x128xf32>
      %c0_20 = arith.constant 0 : index
      %c0_21 = arith.constant 0 : index
      %32 = vector.load %arg14[%c0_20, %c0_21] : memref<1x128xf32, #tpu.memory_space<vmem>>, vector<1x128xf32>
      %33 = vector.broadcast %32 : vector<1x128xf32> to vector<64x128xf32>
      %34 = arith.addf %31, %33 : vector<64x128xf32>
      %c0_22 = arith.constant 0 : index
      %c0_23 = arith.constant 0 : index
      %35 = vector.load %arg17[%c0_22, %c0_23] : memref<64x128xf32, #tpu.memory_space<vmem>>, vector<64x128xf32>
      %36 = arith.addf %34, %35 : vector<64x128xf32>
      %c0_24 = arith.constant 0 : index
      %c0_25 = arith.constant 0 : index
      %c0_26 = arith.constant 0 : index
      %37 = vector.load %arg15[%c0_24, %c0_25, %c0_26] : memref<1x64x128xf32, #tpu.memory_space<vmem>>, vector<1x64x128xf32>
      %38 = vector.shape_cast %37 : vector<1x64x128xf32> to vector<64x128xf32>
      %39 = vector.shape_cast %36 : vector<64x128xf32> to vector<1x64x128xf32>
      tpu.vector_store %arg15[%c0_24, %c0_25, %c0_26], %39 {strides = array<i32>} : memref<1x64x128xf32, #tpu.memory_space<vmem>>, vector<1x64x128xf32>,
    } else {
    }
    return
  }
  func.func @transform_0(%arg0: i32, %arg1: i32) -> (i32, i32, i32) {
    %c0_i32 = arith.constant 0 : i32
    %c0_i32_0 = arith.constant 0 : i32
    %c0_i32_1 = arith.constant 0 : i32
    return %arg0, %c0_i32, %c0_i32_0 : i32, i32, i32
  }
  func.func @transform_1(%arg0: i32, %arg1: i32) -> (i32, i32) {
    %c0_i32 = arith.constant 0 : i32
    %c0_i32_0 = arith.constant 0 : i32
    %c0_i32_1 = arith.constant 0 : i32
    return %c0_i32, %c0_i32_0 : i32, i32
  }
  func.func @transform_2(%arg0: i32, %arg1: i32) -> (i32, i32) {
    %c0_i32 = arith.constant 0 : i32
    %c0_i32_0 = arith.constant 0 : i32
    %c0_i32_1 = arith.constant 0 : i32
    return %c0_i32, %c0_i32_0 : i32, i32
  }
  func.func @transform_3(%arg0: i32, %arg1: i32) -> (i32, i32) {
    %c0_i32 = arith.constant 0 : i32
    %c0_i32_0 = arith.constant 0 : i32
    %c0_i32_1 = arith.constant 0 : i32
    return %c0_i32, %c0_i32_0 : i32, i32
  }
  func.func @transform_4(%arg0: i32, %arg1: i32) -> (i32, i32) {
    %c0_i32 = arith.constant 0 : i32
    %c0_i32_0 = arith.constant 0 : i32
    %c0_i32_1 = arith.constant 0 : i32
    return %c0_i32, %c0_i32_0 : i32, i32
  }
  func.func @transform_5(%arg0: i32, %arg1: i32) -> (i32, i32) {
    %c0_i32 = arith.constant 0 : i32
    %c0_i32_0 = arith.constant 0 : i32
    %c0_i32_1 = arith.constant 0 : i32
    return %c0_i32, %c0_i32_0 : i32, i32
  }
  func.func @transform_6(%arg0: i32, %arg1: i32) -> (i32, i32) {
    %c0_i32 = arith.constant 0 : i32
    %c0_i32_0 = arith.constant 0 : i32
    %c0_i32_1 = arith.constant 0 : i32
    return %c0_i32, %c0_i32_0 : i32, i32
  }
  func.func @transform_7(%arg0: i32, %arg1: i32) -> (i32, i32) {
    %c0_i32 = arith.constant 0 : i32
    %c0_i32_0 = arith.constant 0 : i32
    %c0_i32_1 = arith.constant 0 : i32
    return %c0_i32, %c0_i32_0 : i32, i32
  }
  func.func @transform_8(%arg0: i32, %arg1: i32) -> (i32, i32) {
    %c0_i32 = arith.constant 0 : i32
    %c0_i32_0 = arith.constant 0 : i32
    %c0_i32_1 = arith.constant 0 : i32
    return %c0_i32, %c0_i32_0 : i32, i32
  }
  func.func @transform_9(%arg0: i32, %arg1: i32) -> (i32, i32) {
    %c0_i32 = arith.constant 0 : i32
    %c0_i32_0 = arith.constant 0 : i32
    return %c0_i32, %arg1 : i32, i32
  }
  func.func @transform_10(%arg0: i32, %arg1: i32) -> (i32, i32) {
    %c0_i32 = arith.constant 0 : i32
    %c0_i32_0 = arith.constant 0 : i32
    return %c0_i32, %arg1 : i32, i32
  }
  func.func @transform_11(%arg0: i32, %arg1: i32) -> (i32, i32) {
    %c0_i32 = arith.constant 0 : i32
    %c0_i32_0 = arith.constant 0 : i32
    return %arg1, %c0_i32 : i32, i32
  }
  func.func @transform_12(%arg0: i32, %arg1: i32) -> (i32, i32) {
    %c0_i32 = arith.constant 0 : i32
    %c0_i32_0 = arith.constant 0 : i32
    %c0_i32_1 = arith.constant 0 : i32
    return %c0_i32, %c0_i32_0 : i32, i32
  }
  func.func @transform_13(%arg0: i32, %arg1: i32) -> (i32, i32, i32) {
    %c0_i32 = arith.constant 0 : i32
    %c0_i32_0 = arith.constant 0 : i32
    %c0_i32_1 = arith.constant 0 : i32
    return %arg0, %c0_i32, %c0_i32_0 : i32, i32, i32
  }
}

</mosaic_0001>

<bundles_post_ra>
// kernel: tpu_custom_call.1
= control target key start
LH: loop header
LB: loop body
LE: loop exit
PB: predicated region body
PF: predicated region fallthrough
CT: control target
= control target key end

     0   :  { %s3962_s0 = inlined_call_operand.hbm [shape: f32[2,64,128], index: 0, kind: input, shape index: {}]   ;;  %s3963_s1 = inlined_call_operand.hbm [shape: f32[1,128], index: 1, kind: input, shape index: {}]   ;;  %s3964_s2 = inlined_call_operand.hbm [shape: f32[1,128], index: 2, kind: input, shape index: {}]   ;;  %s3965_s3 = inlined_call_operand.hbm [shape: bf16[128,384], index: 3, kind: input, shape index: {}]   ;;  %s3966_s4 = inlined_call_operand.vmem [shape: f32[1,384], index: 4, kind: input, shape index: {}]   ;;  %s3967_s5 = inlined_call_operand.hbm [shape: bf16[128,128], index: 5, kind: input, shape index: {}]   ;;  %s3968_s6 = inlined_call_operand.hbm [shape: f32[1,128], index: 6, kind: input, shape index: {}]   ;;  %s3969_s7 = inlined_call_operand.vmem [shape: f32[1,128], index: 7, kind: input, shape index: {}]   ;;  %s3970_s8 = inlined_call_operand.vmem [shape: f32[1,128], index: 8, kind: input, shape index: {}]   ;;  %s3971_s9 = inlined_call_operand.hbm [shape: bf16[128,256], index: 9, kind: input, shape index: {}]   ;;  %s3972_s10 = inlined_call_operand.vmem [shape: f32[1,256], index: 10, kind: input, shape index: {}]   ;;  %s3973_s11 = inlined_call_operand.hbm [shape: bf16[256,128], index: 11, kind: input, shape index: {}]   ;;  %s3974_s12 = inlined_call_operand.vmem [shape: f32[1,128], index: 12, kind: input, shape index: {}]   ;;  %s3975_s13 = inlined_call_operand.hbm [shape: f32[2,64,128], index: 13, kind: output, shape index: {}]  }
   0x1   :  { %3988 = sst [smem:[#allocation36_spill]] %s3962_s0 }
   0x2   :  { %3989 = sst [smem:[#allocation37_spill]] %s3963_s1 }
   0x3   :  { %3990 = sst [smem:[#allocation38_spill]] %s3964_s2 }
   0x4   :  { %3991 = sst [smem:[#allocation39_spill]] %s3965_s3 }
   0x5   :  { %3992 = sst [smem:[#allocation40_spill]] %s3966_s4 }
   0x6   :  { %3993 = sst [smem:[#allocation41_spill]] %s3969_s7 }
   0x7   :  { %3994 = sst [smem:[#allocation42_spill]] %s3970_s8 }
   0x8   :  { %3995 = sst [smem:[#allocation43_spill]] %s3971_s9 }
   0x9   :  { %3996 = sst [smem:[#allocation44_spill]] %s3972_s10 }
   0xa   :  { %3997 = sst [smem:[#allocation45_spill]] %s3973_s11 }
   0xb   :  { %3998 = sst [smem:[#allocation46_spill]] %s3974_s12 }
   0xc   :  { %3999 = sst [smem:[#allocation47_spill]] %s3975_s13 }
   0xd   :  { %18 = vsyncpa [#allocation7], 0 }
   0xe   :  { %20 = vsyncpa [#allocation7 + $0x1], 0 }
   0xf   :  { %21 = vsyncpa [#allocation10], 0 }
  0x10   :  { %22 = vsyncpa [#allocation13], 0 }
  0x11   :  { %23 = vsyncpa [#allocation16], 0 }
  0x12   :  { %24 = vsyncpa [#allocation8], 0 }
  0x13   :  { %26 = vsyncpa [#allocation8 + $0x1], 0  ;;  %s3287_s25 = smov 0   ;;  %s3289_s26 = smov 0  }
  0x14   :  { %s3291_s27 = smov 0   ;;  %s3293_s28 = smov 0  }
  0x15   :  { %s3295_s29 = smov 0   ;;  %s3297_s30 = smov 0  }
  0x16   :  { %s3299_s14 = smov 0   ;;  %s3301_s15 = smov 0  }
  0x17   :  { %s3303_s16 = smov 0   ;;  %s3305_s17 = smov 0  }
  0x18   :  { %s3307_s18 = smov 0  }
  0x19 LB: > { %4000 = sst [smem:[#allocation26_spill]] %s3180_s30  ;;  %s3343_s19 = sadd.s32 4294967295, %s3200_s18   ;;  %s3200_s18 = sphi %s3307_s18, %s32_s18   ;;  %s3196_s17 = sphi %s3305_s17, %s4052_s17   ;;  %s3192_s16 = sphi %s3303_s16, %s4060_s16   ;;  %s3188_s15 = sphi %s3301_s15, %s4050_s15   ;;  %s3184_s14 = sphi %s3299_s14, %s4059_s14   ;;  %s3180_s30 = sphi %s3297_s30, %s4058_s30   ;;  %s3176_s29 = sphi %s3295_s29, %s4057_s29   ;;  %s3172_s28 = sphi %s3293_s28, %s4056_s28   ;;  %s3168_s27 = sphi %s3291_s27, %s4055_s27   ;;  %s3164_s26 = sphi %s3289_s26, %s4054_s26   ;;  %s3160_s25 = sphi %s3287_s25, %s4053_s25  }
  0x1a   : > { %4001 = sst [smem:[#allocation27_spill]] %s3184_s14  ;;  %s2197_s20 = sadd.s32 4294967294, %s3200_s18  }
  0x1b   : > { %4002 = sst [smem:[#allocation28_spill]] %s3188_s15  ;;  %s41_s21 = sadd.s32 1, %s3192_s16 }
  0x1c   : > { %4003 = sst [smem:[#allocation29_spill]] %s3196_s17  ;;  %s44_s22 = sadd.s32 1, %s3196_s17 }
  0x1d   : > { %p42_p0 = scmp.ge.s32.totalorder %s41_s21, 2  ;;  %s51_s23 = sadd.s32 1, %s3180_s30 }
  0x1e   : > { %p58_p1 = scmp.ne.s32.totalorder %s3180_s30, %s3176_s29  ;;  %p59_p2 = scmp.eq.s32.totalorder %s3200_s18, 0 }
  0x1f   : > { %s4062_s21 = smov (%p42_p0, %s41_s21), 0  ;;  %s4064_s22 = smov (!%p42_p0, %s44_s22), %s3196_s17 }
  0x20   : > { %4004 = sst [smem:[#allocation30_spill]] %s4062_s21  ;;  %p3360_p3 = por %p59_p2, %p58_p1 }
  0x21   : > { %p64_p4 = scmp.ne.s32.totalorder %s3176_s29, %s3172_s28  ;;  %p46_p5 = scmp.ge.s32.totalorder %s4064_s22, 2 }
  0x22   : > { %p65_p6 = scmp.eq.s32.totalorder %s3343_s19, 0  ;;  %s242_s13 = ssub.s32 %s3192_s16, %s4062_s21 }
  0x23   : > { %p355_p7 = scmp.eq.s32.totalorder %s3343_s19, 3  ;;  %s4066_s22 = smov (%p46_p5, %s4064_s22), 0 }
  0x24   : > { %4006 = sst [smem:[#allocation31_spill]] %s4066_s22  ;;  %p3377_p8 = por %p65_p6, %p64_p4 }
  0x25   : > { %p3381_p9 = scmp.eq.s32.totalorder %s242_s13, 0  ;;  %s48_s8 = ssub.s32 %s3196_s17, %s4066_s22 }
  0x26   : > { %s4007_s15 = scalar_select %p3377_p8, 1, 0 }
  0x27   : > { %p3390_p10 = por %p355_p7, %p58_p1  ;;  %p49_p11 = scmp.eq.s32.totalorder %s48_s8, 0 }
  0x28   : > { %4008 = sst [smem:[#allocation32_spill]] %s4007_s15  ;;  %p361_p12 = scmp.eq.s32.totalorder %s2197_s20, 3 }
  0x29   : > { %s4010_s7 = scalar_select %p3390_p10, 1, 0 }
  0x2a   : > { %s3395_s21 = scalar_select %p49_p11, %s3180_s30, %s51_s23  }
  0x2b   : > { %4011 = sst [smem:[#allocation33_spill]] %s4010_s7  ;;  %p3400_p13 = por %p361_p12, %p64_p4 }
  0x2c   : > { %4012 = sst [smem:[#allocation34_spill]] %s3395_s21  ;;  %p2615_p0 = scmp.lt.s32.totalorder %s3200_s18, 4 }
  0x2d   : > { %s4013_s4 = scalar_select %p3400_p13, 1, 0 }
  0x2e   : > { %s457_s13 = sand.u32 1, %s3200_s18   ;;  %s459_s22 = sand.u32 1, %s3180_s30  }
  0x2f   : > { %4014 = sst [smem:[#allocation35_spill]] %s4013_s4  ;;  %s2205_s10 = sshll.u32 %s459_s22, 6 }
  0x30   : > { %s2442_s14 = sshll.u32 %s3196_s17, 6  ;;  %s4015_s0 = sld [smem:[#allocation36_spill]] }
  0x31   : > { %s461_s8 = scalar_lea.vmem [#allocation6], %s2205_s10  ;;  %p2597_p1 = pnand %p2615_p0, %p3360_p3 }
  0x32   : > { %s469_s20 = sshll.u32 %s461_s8, 4  ;;  %s3415_s21 = scalar_lea.sflag [#allocation7], %s457_s13  ;;  %s470_s20 = int_to_ptr.vmem [resolvable:$true] %s469_s20 }
  0x33   : > { %s3986_s4 = smov 128   ;;  %s3203_s30 = smov 8  }
  0x34   : > { %p2198_p4 = scmp.ge.s32.totalorder %s3200_s18, 1  ;;  %p368_p5 = scmp.lt.s32.totalorder %s3200_s18, 5 }
  0x35   : > { %s4016_s1 = sld [smem:[#allocation37_spill]]  ;;  %s3204_s15 = smov [#allocation9]  }
  0x36   : > { %s466_s11 = scalar_lea.hbm %s4015_s0, %s2442_s14  ;;  %p3425_p7 = pnand %p2198_p4, %p368_p5 }
  0x37   : > { %s467_s23 = sshll.u32 %s466_s11, 4  ;;  %s382_s22 = sshll.u32 %s3204_s15, 4  ;;  %s468_s23 = int_to_ptr.hbm [resolvable:$true] %s467_s23  ;;  %s383_s22 = int_to_ptr.vmem [resolvable:$true] %s382_s22 }
  0x38   : > { %2599 = dma.hbm_to_vmem [thread:$0]  (!%p2597_p1), %s468_s23, 1024, %s470_s20, %s3415_s21, %s3986_s4, %s3986_s4, %s3203_s30  }
  0x39   : > { %s4018_s3 = sld [smem:[#allocation39_spill]]  ;;  %p2580_p3 = pneg %p3425_p7 }
  0x3a   : > { %s3205_s20 = smov [#allocation12]   ;;  %s3206_s7 = smov 192  }
  0x3b   : > { %s380_s11 = sshll.u32 %s4016_s1, 4  ;;  %p3436_p11 = pnand %p2580_p3, %p65_p6  ;;  %s381_s11 = int_to_ptr.hbm [resolvable:$true] %s380_s11 }
  0x3c   : > { %s405_s23 = sshll.u32 %s3205_s20, 4  ;;  %s3207_s10 = smov 12   ;;  %s406_s23 = int_to_ptr.vmem [resolvable:$true] %s405_s23 }
  0x3d   : > { %2583 = dma.hbm_to_vmem [thread:$0]  (!%p3436_p11), %s381_s11, 16, %s383_s22, [#allocation10]  }
  0x3e   : > { %s245_s15 = sadd.s32 1, %s3168_s27  ;;  %p252_p12 = scmp.ne.s32.totalorder %s3168_s27, %s3164_s26 }
  0x3f   : > { %s403_s13 = sshll.u32 %s4018_s3, 4  ;;  %p258_p1 = scmp.ne.s32.totalorder %s3164_s26, %s3160_s25  ;;  %s404_s13 = int_to_ptr.hbm [resolvable:$true] %s403_s13 }
  0x40   : > { %2589 = dma.hbm_to_vmem [thread:$0]  (!%p3436_p11), %s404_s13, 3072, %s406_s23, [#allocation13], %s3206_s7, %s3206_s7, %s3207_s10  }
  0x41   : > { %s3448_s30 = scalar_select %p3381_p9, %s3168_s27, %s245_s15  }
  0x42   : > { %p254_p4 = por %p252_p12, %p59_p2  ;;  %p3458_p5 = por %p258_p1, %p65_p6 }
  0x43   : > { %s481_s11 = sand.u32 1, %s3168_s27   ;;  %s2209_s22 = sshll.u32 %s3192_s16, 2 }
  0x44   : > { %s3464_s20 = sshll.u32 %s481_s11, 6  ;;  %s4021_s9 = sld [smem:[#allocation43_spill]] }
  0x45   : > { %s483_s25 = scalar_lea.vmem [#allocation17], %s3464_s20  ;;  %p3472_p2 = pnand %p2615_p0, %p254_p4 }
  0x46   : > { %s490_s10 = sshll.u32 %s483_s25, 4  ;;  %s4023_s2 = sld [smem:[#allocation38_spill]]  ;;  %s491_s10 = int_to_ptr.vmem [resolvable:$true] %s490_s10 }
  0x47   : > { %s3208_s13 = smov 64   ;;  %s4024_s23 = smov 128  }
  0x48   : > { %s3211_s17 = smov [#allocation14]   ;;  %s3212_s1 = smov [#allocation15]  }
  0x49   : > { %s437_s3 = sshll.u32 %s3212_s1, 4  ;;  %s510_s0 = scalar_lea.vmem [#allocation18], %s3464_s20  ;;  %s438_s3 = int_to_ptr.vmem [resolvable:$true] %s437_s3 }
  0x4a   : > { %s487_s12 = scalar_lea.hbm %s4021_s9, %s2209_s22  ;;  %s3209_s22 = smov 4  }
  0x4b   : > { %s488_s7 = sshll.u32 %s487_s12, 4  ;;  %s3210_s12 = smov [#allocation11]   ;;  %s489_s7 = int_to_ptr.hbm [resolvable:$true] %s488_s7 }
  0x4c   : > { %s392_s11 = sshll.u32 %s4023_s2, 4  ;;  %s394_s25 = sshll.u32 %s3210_s12, 4  ;;  %s393_s11 = int_to_ptr.hbm [resolvable:$true] %s392_s11  ;;  %s395_s25 = int_to_ptr.vmem [resolvable:$true] %s394_s25 }
  0x4d   : > { %2602 = dma.hbm_to_vmem [thread:$0]  (!%p3472_p2), %s489_s7, 1024, %s491_s10, %s3415_s21, %s4024_s23, %s3208_s13, %s3209_s22  }
  0x4e   : > { %s420_s9 = sshll.u32 %s3967_s5, 4  ;;  %s435_s2 = sshll.u32 %s3968_s6, 4  ;;  %s421_s9 = int_to_ptr.hbm [resolvable:$true] %s420_s9  ;;  %s436_s2 = int_to_ptr.hbm [resolvable:$true] %s435_s2 }
  0x4f   : > { %2586 = dma.hbm_to_vmem [thread:$0]  (!%p3436_p11), %s393_s11, 16, %s395_s25, [#allocation10]  }
  0x50   : > { %s422_s7 = sshll.u32 %s3211_s17, 4  ;;  %s2443_s10 = sshll.u32 %s3192_s16, 6  ;;  %s423_s7 = int_to_ptr.vmem [resolvable:$true] %s422_s7 }
  0x51   : > { %2592 = dma.hbm_to_vmem [thread:$0]  (!%p3436_p11), %s421_s9, 1024, %s423_s7, [#allocation13], %s3208_s13, %s3208_s13, %s3209_s22  }
  0x52   : > { %2595 = dma.hbm_to_vmem [thread:$0]  (!%p3436_p11), %s436_s2, 16, %s438_s3, [#allocation16]  }
  0x53   : > { %s4025_s12 = sld [smem:[#allocation45_spill]]  ;;  %s518_s4 = sshll.u32 %s510_s0, 4  ;;  %s519_s4 = int_to_ptr.vmem [resolvable:$true] %s518_s4 }
  0x54   : > { %s532_s9 = sand.u32 (!%p3425_p7), 1, %s3343_s19   ;;  %s534_s8 = sand.u32 (!%p3425_p7), 1, %s3176_s29  }
  0x55   : > { %s2214_s20 = sshll.u32 (!%p3425_p7), %s534_s8, 6  ;;  %s533_s7 = scalar_lea.sflag (!%p3425_p7), [#allocation7], %s532_s9 }
  0x56   : > { %s3517_s1 = scalar_lea.vmem (!%p3425_p7), [#allocation6], %s2214_s20 }
  0x57   : > { %530 = sbr.rel (%p3425_p7) target bundleno = 1965 (0x7ad), region = 72 }
  0x59   : > { %s515_s25 = scalar_lea.hbm %s4025_s12, %s2443_s10 }
  0x5a   : > { %s516_s17 = sshll.u32 %s515_s25, 4  ;;  %s517_s17 = int_to_ptr.hbm [resolvable:$true] %s516_s17 }
  0x5b   : > { %2605 = dma.hbm_to_vmem [thread:$0]  (!%p3472_p2), %s517_s17, 1024, %s519_s4, %s3415_s21, %s3208_s13, %s3208_s13, %s3209_s22  }
  0x5c   : > { %3135 = dma.done.wait (%p3377_p8), %s533_s7, 1024  }
  0x5d   : > { %3137 = vsyncadd (%p3377_p8), %s533_s7, 4294966272 }
  0x5e   : > { %3139 = dma.done.wait (%p65_p6), [#allocation10], 32  }
  0x5f   : > { %3141 = vsyncadd (%p65_p6), [#allocation10], 4294967264 }
  0x60   : > { %3143 = dma.done.wait (%p65_p6), [#allocation13], 4096  }
  0x61   : > { %3145 = vsyncadd (%p65_p6), [#allocation13], 4294963200 }
  0x62   : > { %3147 = dma.done.wait (%p65_p6), [#allocation16], 16  }
  0x63   : > { %3149 = vsyncadd (%p65_p6), [#allocation16], 4294967280  ;;  %s569_s21 = sand.u32 1, %s3164_s26  }
  0x64   : > { %s2220_s14 = sshll.u32 %s569_s21, 6 }
  0x65   : > { %s3536_s15 = scalar_lea.vmem [#allocation17], %s2220_s14 }
  0x66   : > { %3151 = dma.done.wait (%p3458_p5), %s533_s7, 2048  }
  0x67   : > { %3153 = vsyncadd (%p3458_p5), %s533_s7, 4294965248  ;;  %s4027_s13 = sld [smem:[#allocation27_spill]]  ;;  %s3550_s23 = scalar_lea.vmem [#allocation18], %s2220_s14 }
  0x68   : > { %s4028_s10 = sld [smem:[#allocation44_spill]]  ;;  %s3552_s12 = scalar_lea.vmem [#allocation19], %s2214_s20 }
  0x6d   : > { %p638_p8 = scmp.lt.s32.totalorder %s4027_s13, 1  ;;  %p2223_p6 = scmp.ne.s32.totalorder %s4027_s13, 0 }
  0x6e   : > { %s4037_s0 = sld [smem:[#allocation40_spill]] (!%p2223_p6) }
  0x6f   : > { %s3544_s22 = scalar_select %p638_p8, %s4027_s13, 1 }
  0x70   : > { %646 = sbr.rel (%p2223_p6) target bundleno = 1574 (0x626), region = 108  ;;  %s4038_s2 = sld [smem:[#allocation41_spill]] (!%p2223_p6) }
  0x71   : > { %s640_s11 = scalar_lea.vmem %s4028_s10, %s3544_s22  ;;  %s4039_s7 = sld [smem:[#allocation42_spill]] (!%p2223_p6) }
  0x75   : > { %v653_v0 = vld [vmem:[%s3517_s1 + $0x30] sm:$0xff]  ;;  %v651_v1 = vld [vmem:[%s3517_s1 + $0x20] sm:$0xff]  ;;  %v654_v3 = vld [vmem:[%s3517_s1 + $0x38] sm:$0xff]  ;;  %v3213_v8 = vmov 128.0  }
  0x76   : > { %v647_v2 = vld [vmem:[%s3517_s1] sm:$0xff]  ;;  %669 = vadd.xlane.f32.xlu1 %v653_v0  ;;  %665 = vadd.xlane.f32.xlu0 %v651_v1  ;;  %v652_v4 = vld [vmem:[%s3517_s1 + $0x28] sm:$0xff]  ;;  %v649_v6 = vld [vmem:[%s3517_s1 + $0x10] sm:$0xff]  ;;  %2730 = vrcp.f32 %v3213_v8 }
  0x77   : > { %657 = vadd.xlane.f32.xlu2 %v647_v2  ;;  %v648_v5 = vld [vmem:[%s3517_s1 + $0x8] sm:$0xff]  ;;  %v650_v7 = vld [vmem:[%s3517_s1 + $0x18] sm:$0xff]  ;;  %v2465_v49 = vld [vmem:[#allocation12 + $0xac] sm:$0xf] }
  0x78   : > { %v2310_v47 = vld [vmem:[#allocation12 + $0xa8] sm:$0xf]  ;;  %v2466_v48 = vld [vmem:[#allocation12 + $0xb0] sm:$0xf0]  ;;  %v2312_v51 = vld [vmem:[#allocation12 + $0xb4] sm:$0xf0] }
  0x79   : > { %v2311_v50 = vor.u32 %v2466_v48, %v2310_v47  ;;  %v2315_v52 = vor.u32 %v2465_v49, %v2312_v51  ;;  %v2298_v53 = vld [vmem:[#allocation12 + $0x90] sm:$0xf]  ;;  %v2463_v54 = vld [vmem:[#allocation12 + $0x98] sm:$0xf0]  ;;  %v2462_v55 = vld [vmem:[#allocation12 + $0x94] sm:$0xf] }
  0x7a   : > { %v2299_v56 = vor.u32 %v2463_v54, %v2298_v53  ;;  %v2300_v57 = vld [vmem:[#allocation12 + $0x9c] sm:$0xf0]  ;;  %v2286_v59 = vld [vmem:[#allocation12 + $0x78] sm:$0xf]  ;;  %v2460_v60 = vld [vmem:[#allocation12 + $0x80] sm:$0xf0] }
  0x7b   : > { %2520 = vmatpush.bf16.msra.mxu2 %v2311_v50  ;;  %1018 = vmatpush.bf16.msra.mxu0 %v2311_v50  ;;  %v2303_v58 = vor.u32 %v2462_v55, %v2300_v57  ;;  %v2459_v61 = vld [vmem:[#allocation12 + $0x7c] sm:$0xf]  ;;  %v2287_v62 = vor.u32 %v2460_v60, %v2286_v59  ;;  %v2288_v63 = vld [vmem:[#allocation12 + $0x84] sm:$0xf0]  ;;  %v2454_v8 = vld [vmem:[#allocation12 + $0x50] sm:$0xf0] }
  0x7c   : > { %v2731_v9 = vpop.eup %2730  ;;  %2528 = vmatpush.bf16.msra.mxu3 %v2315_v52  ;;  %1047 = vmatpush.bf16.msra.mxu1 %v2315_v52  ;;  %v2318_v48 = vld [vmem:[#allocation12 + $0xb0] sm:$0xf]  ;;  %v2467_v49 = vld [vmem:[#allocation12 + $0xb8] sm:$0xf0]  ;;  %v2306_v59 = vld [vmem:[#allocation12 + $0x98] sm:$0xf] }
  0x7d   : > { %v674_v10 = vmul.f32 128.0, %v2731_v9  ;;  %vm678_vm0 = vweird.f32 %v2731_v9  ;;  %v2319_v53 = vor.u32 %v2467_v49, %v2318_v48  ;;  %v2464_v60 = vld [vmem:[#allocation12 + $0xa0] sm:$0xf0]  ;;  %v2258_v48 = vld [vmem:[#allocation12 + $0x38] sm:$0xf] }
  0x7e   : > { %671 = vadd.xlane.f32.xlu1 %v654_v3  ;;  %667 = vadd.xlane.f32.xlu0 %v652_v4  ;;  %v2452_v49 = vld [vmem:[#allocation12 + $0x40] sm:$0xf0] }
  0x7f   : > { %659 = vadd.xlane.f32.xlu2 %v648_v5  ;;  %v675_v11 = vsub.f32 1.0, %v674_v10  ;;  %2521 = vmatpush.bf16.msra.mxu2 %v2299_v56 }
  0x80   : > { %1019 = vmatpush.bf16.msra.mxu0 %v2299_v56  ;;  %2529 = vmatpush.bf16.msra.mxu3 %v2303_v58 }
  0x81   : > { %v676_v12 = vmul.f32 %v2731_v9, %v675_v11  ;;  %1048 = vmatpush.bf16.msra.mxu1 %v2303_v58  ;;  %v2264_v11 = vld [vmem:[#allocation12 + $0x54] sm:$0xf0] }
  0x83   : > { %v677_v13 = vadd.f32 %v2731_v9, %v676_v12  ;;  %2522 = vmatpush.bf16.msra.mxu2 %v2287_v62 }
  0x84   : > { %1020 = vmatpush.bf16.msra.mxu0 %v2287_v62 }
  0x85   : > { %v3563_v14 = vsel %vm678_vm0, %v2731_v9, %v677_v13  ;;  %v2453_v9 = vld [vmem:[#allocation12 + $0x4c] sm:$0xf]  ;;  %v2250_v13 = vld [vmem:[#allocation12 + $0x30] sm:$0xf] }
  0x86   : > { %661 = vadd.xlane.f32.xlu0 %v649_v6  ;;  %663 = vadd.xlane.f32.xlu1 %v650_v7  ;;  %v2267_v12 = vor.u32 %v2453_v9, %v2264_v11  ;;  %v2282_v9 = vld [vmem:[#allocation12 + $0x68] sm:$0xf] }
  0xe9   : > { %v670_v15 = vpop.xlane.xlu1 %669  ;;  %v666_v16 = vpop.xlane.xlu0 %665 }
  0xea   : > { %v686_v17 = vmul.f32 %v3563_v14, %v670_v15  ;;  %v684_v18 = vmul.f32 %v3563_v14, %v666_v16  ;;  %v658_v19 = vpop.xlane.xlu2 %657  ;;  %v2451_v15 = vld [vmem:[#allocation12 + $0x38] sm:$0xf0]  ;;  %v2450_v16 = vld [vmem:[#allocation12 + $0x34] sm:$0xf] }
  0xeb   : > { %v680_v30 = vmul.f32 %v3563_v14, %v658_v19 }
  0xec   : > { %v3567_v20 = vsub.f32 %v653_v0, %v686_v17  ;;  %v3569_v21 = vsub.f32 %v651_v1, %v684_v18  ;;  %v2291_v0 = vor.u32 %v2459_v61, %v2288_v63  ;;  %v2274_v1 = vld [vmem:[#allocation12 + $0x60] sm:$0xf]  ;;  %v2251_v17 = vor.u32 %v2451_v15, %v2250_v13 }
  0xed   : > { %v3591_v37 = vsub.f32 %v647_v2, %v680_v30  ;;  %v2457_v2 = vld [vmem:[#allocation12 + $0x68] sm:$0xf0]  ;;  %v2252_v18 = vld [vmem:[#allocation12 + $0x3c] sm:$0xf0]  ;;  %v2307_v63 = vor.u32 %v2464_v60, %v2306_v59 }
  0xee   : > { %v702_v22 = vmul.f32 %v3567_v20, %v3567_v20  ;;  %v700_v23 = vmul.f32 %v3569_v21, %v3569_v21  ;;  %2530 = vmatpush.bf16.msra.mxu3 %v2291_v0  ;;  %1049 = vmatpush.bf16.msra.mxu1 %v2291_v0  ;;  %v2255_v19 = vor.u32 %v2450_v16, %v2252_v18  ;;  %v2294_v0 = vld [vmem:[#allocation12 + $0x80] sm:$0xf] }
  0xef   : > { %v696_v42 = vmul.f32 %v3591_v37, %v3591_v37 }
  0xf0   : > { %716 = vadd.xlane.f32.xlu1 %v702_v22  ;;  %712 = vadd.xlane.f32.xlu2 %v700_v23 }
  0xf1   : > { %v672_v24 = vpop.xlane.xlu1 %671  ;;  %v668_v25 = vpop.xlane.xlu0 %667 }
  0xf2   : > { %v687_v26 = vmul.f32 %v3563_v14, %v672_v24  ;;  %v685_v27 = vmul.f32 %v3563_v14, %v668_v25  ;;  %v660_v28 = vpop.xlane.xlu2 %659  ;;  %v2238_v24 = vld [vmem:[#allocation12 + $0x18] sm:$0xf]  ;;  %v2448_v25 = vld [vmem:[#allocation12 + $0x20] sm:$0xf0] }
  0xf3   : > { %v681_v29 = vmul.f32 %v3563_v14, %v660_v28  ;;  %v2239_v28 = vor.u32 %v2448_v25, %v2238_v24 }
  0xf4   : > { %v3579_v31 = vsub.f32 %v654_v3, %v687_v26  ;;  %v3581_v32 = vsub.f32 %v652_v4, %v685_v27  ;;  %v2456_v3 = vld [vmem:[#allocation12 + $0x64] sm:$0xf]  ;;  %v2275_v4 = vor.u32 %v2457_v2, %v2274_v1  ;;  %v2447_v26 = vld [vmem:[#allocation12 + $0x1c] sm:$0xf]  ;;  %v2461_v1 = vld [vmem:[#allocation12 + $0x88] sm:$0xf0] }
  0xf5   : > { %v3583_v33 = vsub.f32 %v648_v5, %v681_v29  ;;  %v2276_v5 = vld [vmem:[#allocation12 + $0x6c] sm:$0xf0]  ;;  %v2240_v29 = vld [vmem:[#allocation12 + $0x24] sm:$0xf0] }
  0xf6   : > { %v701_v34 = vmul.f32 %v3581_v32, %v3581_v32  ;;  %v703_v35 = vmul.f32 %v3579_v31, %v3579_v31  ;;  %2523 = vmatpush.bf16.msra.mxu2 %v2275_v4  ;;  %1021 = vmatpush.bf16.msra.mxu0 %v2275_v4 }
  0xf7   : > { %v697_v36 = vmul.f32 %v3583_v33, %v3583_v33 }
  0xf8   : > { %714 = vadd.xlane.f32.xlu0 %v701_v34  ;;  %718 = vadd.xlane.f32.xlu2 %v703_v35  ;;  %v2243_v34 = vor.u32 %v2447_v26, %v2240_v29 }
  0xf9   : > { %706 = vadd.xlane.f32.xlu1 %v697_v36  ;;  %v662_v38 = vpop.xlane.xlu0 %661  ;;  %v664_v39 = vpop.xlane.xlu1 %663  ;;  %v2226_v36 = vld [vmem:[#allocation12] sm:$0xf] }
  0xfa   : > { %v682_v40 = vmul.f32 %v3563_v14, %v662_v38  ;;  %v683_v43 = vmul.f32 %v3563_v14, %v664_v39  ;;  %v2445_v38 = vld [vmem:[#allocation12 + $0x8] sm:$0xf0]  ;;  %v2444_v39 = vld [vmem:[#allocation12 + $0x4] sm:$0xf] }
  0xfc   : > { %v3594_v41 = vsub.f32 %v649_v6, %v682_v40  ;;  %v3601_v45 = vsub.f32 %v650_v7, %v683_v43  ;;  %v2279_v6 = vor.u32 %v2456_v3, %v2276_v5  ;;  %v2262_v7 = vld [vmem:[#allocation12 + $0x48] sm:$0xf]  ;;  %v2227_v40 = vor.u32 %v2445_v38, %v2226_v36 }
  0xfd   : > { %v2263_v10 = vor.u32 %v2454_v8, %v2262_v7  ;;  %v2295_v8 = vor.u32 %v2461_v1, %v2294_v0 }
  0xfe   : > { %v698_v44 = vmul.f32 %v3594_v41, %v3594_v41  ;;  %v699_v46 = vmul.f32 %v3601_v45, %v3601_v45  ;;  %2531 = vmatpush.bf16.msra.mxu3 %v2279_v6  ;;  %1050 = vmatpush.bf16.msra.mxu1 %v2279_v6 }
  0xff   : > { %2524 = vmatpush.bf16.msra.mxu2 %v2263_v10  ;;  %1022 = vmatpush.bf16.msra.mxu0 %v2263_v10  ;;  %v2458_v10 = vld [vmem:[#allocation12 + $0x70] sm:$0xf0] }
 0x100   : > { %708 = vadd.xlane.f32.xlu2 %v698_v44  ;;  %704 = vadd.xlane.f32.xlu0 %v696_v42  ;;  %v2228_v42 = vld [vmem:[#allocation12 + $0xc] sm:$0xf0]  ;;  %v2283_v24 = vor.u32 %v2458_v10, %v2282_v9 }
 0x101   : > { %v2231_v44 = vor.u32 %v2444_v39, %v2228_v42 }
 0x102   : > { %2532 = vmatpush.bf16.msra.mxu3 %v2267_v12  ;;  %1051 = vmatpush.bf16.msra.mxu1 %v2267_v12 }
 0x103   : > { %2525 = vmatpush.bf16.msra.mxu2 %v2251_v17  ;;  %1023 = vmatpush.bf16.msra.mxu0 %v2251_v17 }
 0x106   : > { %2533 = vmatpush.bf16.msra.mxu3 %v2255_v19  ;;  %1052 = vmatpush.bf16.msra.mxu1 %v2255_v19 }
 0x107   : > { %2526 = vmatpush.bf16.msra.mxu2 %v2239_v28  ;;  %1024 = vmatpush.bf16.msra.mxu0 %v2239_v28 }
 0x108   : > { %710 = vadd.xlane.f32.xlu0 %v699_v46 }
 0x10a   : > { %2534 = vmatpush.bf16.msra.mxu3 %v2243_v34  ;;  %1053 = vmatpush.bf16.msra.mxu1 %v2243_v34  ;;  %v2455_v34 = vld [vmem:[#allocation12 + $0x58] sm:$0xf0] }
 0x10b   : > { %2527 = vmatpush.bf16.msra.mxu2 %v2227_v40  ;;  %1025 = vmatpush.bf16.msra.mxu0 %v2227_v40 }
 0x10e   : > { %2535 = vmatpush.bf16.msra.mxu3 %v2231_v44  ;;  %1054 = vmatpush.bf16.msra.mxu1 %v2231_v44 }
 0x10f   : > { %1076 = vmatpush.bf16.msrb.mxu2 %v2319_v53 }
 0x113   : > { %1077 = vmatpush.bf16.msrb.mxu2 %v2307_v63 }
 0x117   : > { %1078 = vmatpush.bf16.msrb.mxu2 %v2295_v8  ;;  %v2449_v8 = vld [vmem:[#allocation12 + $0x28] sm:$0xf0] }
 0x11b   : > { %1079 = vmatpush.bf16.msrb.mxu2 %v2283_v24 }
 0x163   : > { %v717_v22 = vpop.xlane.xlu1 %716  ;;  %v713_v23 = vpop.xlane.xlu2 %712 }
 0x164   : > { %v724_v27 = vmul.f32 %v713_v23, %v3563_v14  ;;  %v726_v30 = vmul.f32 %v717_v22, %v3563_v14 }
 0x166   : > { %v3607_v35 = vadd.f32 1e-06, %v724_v27  ;;  %v3609_v43 = vadd.f32 1e-06, %v726_v30  ;;  %v2270_v30 = vld [vmem:[#allocation12 + $0x50] sm:$0xf] }
 0x168   : > { %2732 = vrsqrt.f32 %v3607_v35  ;;  %vm782_vm2 = vweird.f32 %v3607_v35  ;;  %vm802_vm10 = vweird.f32 %v3609_v43 }
 0x169   : > { %2734 = vrsqrt.f32 %v3609_v43 }
 0x16b   : > { %v715_v46 = vpop.xlane.xlu0 %714  ;;  %v719_v47 = vpop.xlane.xlu2 %718 }
 0x16c   : > { %v725_v50 = vmul.f32 %v715_v46, %v3563_v14  ;;  %v707_v51 = vpop.xlane.xlu1 %706  ;;  %v727_v52 = vmul.f32 %v719_v47, %v3563_v14  ;;  %v2271_v47 = vor.u32 %v2455_v34, %v2270_v30 }
 0x16d   : > { %v721_v54 = vmul.f32 %v707_v51, %v3563_v14 }
 0x16e   : > { %v3616_v55 = vadd.f32 1e-06, %v725_v50  ;;  %v3618_v56 = vadd.f32 1e-06, %v727_v52  ;;  %v3620_v57 = vpop.eup %2732  ;;  %1080 = vmatpush.bf16.msrb.mxu2 %v2271_v47 }
 0x16f   : > { %v3622_v58 = vadd.f32 1e-06, %v721_v54  ;;  %v777_v61 = vmul.f32 %v3620_v57, %v3607_v35  ;;  %v3630_v2 = vpop.eup %2734  ;;  %vm783_vm1 = vweird.f32 %v3620_v57 }
 0x170   : > { %2736 = vrsqrt.f32 %v3616_v55  ;;  %v797_v12 = vmul.f32 %v3630_v2, %v3609_v43  ;;  %vm3654_vm3 = vmor %vm782_vm2, %vm783_vm1  ;;  %vm792_vm4 = vweird.f32 %v3616_v55  ;;  %vm812_vm11 = vweird.f32 %v3618_v56 }
 0x171   : > { %2738 = vrsqrt.f32 %v3622_v58  ;;  %v778_v62 = vmul.f32 %v3620_v57, %v777_v61  ;;  %vm752_vm6 = vweird.f32 %v3622_v58  ;;  %vm803_vm13 = vweird.f32 %v3630_v2 }
 0x172   : > { %2740 = vrsqrt.f32 %v3618_v56  ;;  %v798_v27 = vmul.f32 %v3630_v2, %v797_v12  ;;  %vm3722_vm1 = vmor %vm802_vm10, %vm803_vm13 }
 0x173   : > { %v705_v3 = vpop.xlane.xlu0 %704  ;;  %v709_v4 = vpop.xlane.xlu2 %708  ;;  %v779_v5 = vmul.f32 0.5, %v778_v62  ;;  %v2259_v62 = vor.u32 %v2452_v49, %v2258_v48 }
 0x174   : > { %v720_v6 = vmul.f32 %v705_v3, %v3563_v14  ;;  %v722_v7 = vmul.f32 %v709_v4, %v3563_v14  ;;  %v799_v51 = vmul.f32 0.5, %v798_v27  ;;  %v3690_v3 = vld [vmem:[#allocation11] ss:$0 sm:$0xff] }
 0x175   : > { %v780_v13 = vsub.f32 1.5, %v779_v5  ;;  %1081 = vmatpush.bf16.msrb.mxu2 %v2259_v62 }
 0x176   : > { %v2737_v11 = vpop.eup %2736  ;;  %v3636_v15 = vadd.f32 1e-06, %v720_v6  ;;  %v3642_v18 = vadd.f32 1e-06, %v722_v7  ;;  %v800_v4 = vsub.f32 1.5, %v799_v51 }
 0x177   : > { %v3638_v16 = vpop.eup %2738  ;;  %v787_v17 = vmul.f32 %v2737_v11, %v3616_v55  ;;  %v781_v22 = vmul.f32 %v3620_v57, %v780_v13  ;;  %vm793_vm5 = vweird.f32 %v2737_v11  ;;  %v2246_v7 = vld [vmem:[#allocation12 + $0x20] sm:$0xf] }
 0x178   : > { %v3644_v19 = vpop.eup %2740  ;;  %v747_v23 = vmul.f32 %v3638_v16, %v3622_v58  ;;  %2742 = vrsqrt.f32 %v3636_v15  ;;  %vm753_vm7 = vweird.f32 %v3638_v16  ;;  %vm794_vm8 = vmor %vm792_vm4, %vm793_vm5  ;;  %v2247_v12 = vor.u32 %v2449_v8, %v2246_v7 }
 0x179   : > { %v788_v25 = vmul.f32 %v2737_v11, %v787_v17  ;;  %v807_v26 = vmul.f32 %v3644_v19, %v3618_v56  ;;  %v785_v35 = vsel %vm3654_vm3, %v3620_v57, %v781_v22  ;;  %2744 = vrsqrt.f32 %v3642_v18  ;;  %v3671_v57 = vld [vmem:[#allocation9] ss:$0 sm:$0xff]  ;;  %vm3682_vm9 = vmor %vm752_vm6, %vm753_vm7  ;;  %v2446_v22 = vld [vmem:[#allocation12 + $0x10] sm:$0xf0] }
 0x17a   : > { %v748_v29 = vmul.f32 %v3638_v16, %v747_v23  ;;  %v820_v52 = vmul.f32 %v785_v35, %v3569_v21  ;;  %vm813_vm12 = vweird.f32 %v3644_v19  ;;  %vm742_vm14 = vweird.f32 %v3636_v15  ;;  %1082 = vmatpush.bf16.msrb.mxu2 %v2247_v12 }
 0x17b   : > { %v789_v36 = vmul.f32 0.5, %v788_v25  ;;  %v808_v38 = vmul.f32 %v3644_v19, %v807_v26  ;;  %v711_v39 = vpop.xlane.xlu0 %710  ;;  %v801_v24 = vmul.f32 %v3630_v2, %v800_v4  ;;  %vm3712_vm0 = vmor %vm812_vm11, %vm813_vm12  ;;  %vm762_vm5 = vweird.f32 %v3642_v18 }
 0x17c   : > { %v749_v40 = vmul.f32 0.5, %v748_v29  ;;  %v723_v42 = vmul.f32 %v711_v39, %v3563_v14  ;;  %v831_v6 = vmul.f32 %v3671_v57, %v820_v52 }
 0x17d   : > { %v790_v44 = vsub.f32 1.5, %v789_v36  ;;  %v809_v46 = vmul.f32 0.5, %v808_v38  ;;  %v805_v43 = vsel %vm3722_vm1, %v3630_v2, %v801_v24 }
 0x17e   : > { %v2743_v50 = vpop.eup %2742  ;;  %v750_v53 = vsub.f32 1.5, %v749_v40  ;;  %v3669_v54 = vadd.f32 1e-06, %v723_v42  ;;  %v842_v27 = vadd.f32 %v3690_v3, %v831_v6 }
 0x17f   : > { %v791_v59 = vmul.f32 %v2737_v11, %v790_v44  ;;  %v737_v60 = vmul.f32 %v2743_v50, %v3636_v15  ;;  %v3687_v63 = vpop.eup %2744  ;;  %v810_v0 = vsub.f32 1.5, %v809_v46  ;;  %vm743_vm15 = vweird.f32 %v2743_v50 }
 0x180   : > { %v751_v61 = vmul.f32 %v3638_v16, %v750_v53  ;;  %2746 = vrsqrt.f32 %v3669_v54  ;;  %v757_v5 = vmul.f32 %v3687_v63, %v3642_v18  ;;  %vm744_vm2 = vmor %vm742_vm14, %vm743_vm15  ;;  %vm772_vm3 = vweird.f32 %v3669_v54 }
 0x181   : > { %v795_v55 = vsel %vm794_vm8, %v2737_v11, %v791_v59  ;;  %v738_v1 = vmul.f32 %v2743_v50, %v737_v60  ;;  %v811_v13 = vmul.f32 %v3644_v19, %v810_v0  ;;  %vm763_vm6 = vweird.f32 %v3687_v63 }
 0x182   : > { %v821_v58 = vmul.f32 %v795_v55, %v3581_v32  ;;  %v755_v9 = vsel %vm3682_vm9, %v3638_v16, %v751_v61  ;;  %v758_v32 = vmul.f32 %v3687_v63, %v757_v5  ;;  %v2234_v16 = vld [vmem:[#allocation12 + $0x8] sm:$0xf]  ;;  %vm764_vm8 = vmor %vm762_vm5, %vm763_vm6  ;;  %vm1150_vm9 = vcmask 523264  }
 0x183   : > { %v739_v10 = vmul.f32 0.5, %v738_v1  ;;  %v817_v25 = vmul.f32 %v755_v9, %v3583_v33  ;;  %v2235_v34 = vor.u32 %v2446_v22, %v2234_v16  ;;  %v815_v35 = vsel %vm3712_vm0, %v3644_v19, %v811_v13  ;;  %v882_v1 = vld [vmem:[%s4037_s0] sm:$0x7] }
 0x184   : > { %v832_v11 = vmul.f32 %v3671_v57, %v821_v58  ;;  %v759_v29 = vmul.f32 0.5, %v758_v32  ;;  %v823_v46 = vmul.f32 %v815_v35, %v3579_v31  ;;  %v884_v4 = vperm.slane %v882_v1, 0 }
 0x185   : > { %v740_v17 = vsub.f32 1.5, %v739_v10  ;;  %v828_v40 = vmul.f32 %v3671_v57, %v817_v25  ;;  %1083 = vmatpush.bf16.msrb.mxu2 %v2235_v34  ;;  %v885_v32 = vperm.slane %v882_v1, 1  ;;  %v886_v26 = vperm.slane %v882_v1, 2 }
 0x186   : > { %v2747_v23 = vpop.eup %2746  ;;  %v843_v15 = vadd.f32 %v3690_v3, %v832_v11  ;;  %v760_v42 = vsub.f32 1.5, %v759_v29  ;;  %v834_v51 = vmul.f32 %v3671_v57, %v823_v46 }
 0x187   : > { %v741_v33 = vmul.f32 %v2743_v50, %v740_v17  ;;  %v767_v56 = vmul.f32 %v2747_v23, %v3669_v54  ;;  %vm773_vm4 = vweird.f32 %v2747_v23  ;;  %v839_v48 = vadd.f32 %v3690_v3, %v828_v40 }
 0x188   : > { %v848_v30 = vpack.c.bf16 %v843_v15, %v842_v27  ;;  %vm774_vm7 = vmor %vm772_vm3, %vm773_vm4  ;;  %v761_v49 = vmul.f32 %v3687_v63, %v760_v42  ;;  %v845_v54 = vadd.f32 %v3690_v3, %v834_v51 }
 0x189   : > { %v745_v36 = vsel %vm744_vm2, %v2743_v50, %v741_v33  ;;  %v768_v38 = vmul.f32 %v2747_v23, %v767_v56 }
 0x18a   : > { %v816_v39 = vmul.f32 %v745_v36, %v3591_v37  ;;  %1036 = vmatmul.bf16.vlgmr.msra.gmra.mxu2 %v848_v30  ;;  %1065 = vmatmul.bf16.vlgmr.msra.gmra.mxu3 %v848_v30  ;;  %v822_v37 = vmul.f32 %v805_v43, %v3567_v20  ;;  %v765_v53 = vsel %vm764_vm8, %v3687_v63, %v761_v49 }
 0x18b   : > { %v769_v44 = vmul.f32 0.5, %v768_v38  ;;  %v818_v59 = vmul.f32 %v765_v53, %v3594_v41 }
 0x18c   : > { %v827_v19 = vmul.f32 %v3671_v57, %v816_v39  ;;  %v833_v18 = vmul.f32 %v3671_v57, %v822_v37 }
 0x18d   : > { %v770_v2 = vsub.f32 1.5, %v769_v44  ;;  %v829_v62 = vmul.f32 %v3671_v57, %v818_v59 }
 0x18e   : > { %v838_v47 = vadd.f32 %v3690_v3, %v827_v19  ;;  %v844_v60 = vadd.f32 %v3690_v3, %v833_v18 }
 0x18f   : > { %v771_v50 = vmul.f32 %v2747_v23, %v770_v2  ;;  %v840_v0 = vadd.f32 %v3690_v3, %v829_v62 }
 0x190   : > { %v846_v31 = vpack.c.bf16 %v839_v48, %v838_v47  ;;  %v849_v61 = vpack.c.bf16 %v845_v54, %v844_v60 }
 0x191   : > { %v775_v52 = vsel %vm774_vm7, %v2747_v23, %v771_v50 }
 0x192   : > { %1026 = vmatmul.bf16.vlgmr.msra.gmra.mxu0 %v846_v31  ;;  %1055 = vmatmul.bf16.vlgmr.msra.gmra.mxu1 %v846_v31  ;;  %v819_v20 = vmul.f32 %v775_v52, %v3601_v45 }
 0x194   : > { %v830_v21 = vmul.f32 %v3671_v57, %v819_v20 }
 0x196   : > { %v841_v55 = vadd.f32 %v3690_v3, %v830_v21 }
 0x198   : > { %v847_v63 = vpack.c.bf16 %v841_v55, %v840_v0 }
 0x19a   : > { %1041 = vmatmul.bf16.gmra.mxu2 %v849_v61  ;;  %1070 = vmatmul.bf16.gmra.mxu3 %v849_v61 }
 0x1a2   : > { %1031 = vmatmul.bf16.gmra.mxu0 %v847_v63  ;;  %1060 = vmatmul.bf16.gmra.mxu1 %v847_v63 }
 0x1aa   : > { %1084 = vmatmul.bf16.vlgmr.msrb.gmra.mxu2 %v846_v31 }
 0x1ba   : > { %1089 = vmatmul.bf16.gmra.mxu2 %v847_v63 }
 0x1ca   : > { %1094 = vmatmul.bf16.gmra.mxu2 %v848_v30 }
 0x1da   : > { %1099 = vmatmul.bf16.gmra.mxu2 %v849_v61 }
 0x20d   : > { %v1037_v41 = vpop.f32.mrf.mxu2  ;;  %v1066_v45 = vpop.f32.mrf.mxu3 }
 0x20e   : > { %v1038_v6 = vadd.f32 %v1037_v41, %v884_v4  ;;  %v1067_v28 = vadd.f32 %v1066_v45, %v885_v32 }
 0x20f   : > { %v1056_v58 = vpop.f32.mrf.mxu1  ;;  %v1027_v30 = vpop.f32.mrf.mxu0 }
 0x210   : > { %v1057_v46 = vadd.f32 %v1056_v58, %v885_v32  ;;  %v1028_v37 = vadd.f32 %v1027_v30, %v884_v4 }
 0x215   : > { %v1039_v57 = vpop.f32.mrf.mxu2  ;;  %v1068_v5 = vpop.f32.mrf.mxu3 }
 0x216   : > { %v1040_v7 = vadd.f32 %v1039_v57, %v884_v4  ;;  %v1069_v27 = vadd.f32 %v1068_v5, %v885_v32 }
 0x217   : > { %v1058_v8 = vpop.f32.mrf.mxu1  ;;  %v1029_v40 = vpop.f32.mrf.mxu0 }
 0x218   : > { %v1107_v3 = vpack.c.bf16 %v1040_v7, %v1038_v6  ;;  %v1111_v29 = vpack.c.bf16 %v1069_v27, %v1067_v28  ;;  %v1059_v42 = vadd.f32 %v1058_v8, %v885_v32  ;;  %v1030_v2 = vadd.f32 %v1029_v40, %v884_v4 }
 0x21a   : > { %v1109_v19 = vpack.c.bf16 %v1059_v42, %v1057_v46  ;;  %v1105_v49 = vpack.c.bf16 %v1030_v2, %v1028_v37 }
 0x21d   : > { %v1042_v9 = vpop.f32.mrf.mxu2  ;;  %v1071_v10 = vpop.f32.mrf.mxu3 }
 0x21e   : > { %v1043_v13 = vadd.f32 %v1042_v9, %v884_v4  ;;  %v1072_v17 = vadd.f32 %v1071_v10, %v885_v32 }
 0x21f   : > { %v1061_v23 = vpop.f32.mrf.mxu1  ;;  %v1032_v48 = vpop.f32.mrf.mxu0 }
 0x220   : > { %v1062_v36 = vadd.f32 %v1061_v23, %v885_v32  ;;  %v1033_v52 = vadd.f32 %v1032_v48, %v884_v4 }
 0x225   : > { %v1044_v11 = vpop.f32.mrf.mxu2  ;;  %v1073_v12 = vpop.f32.mrf.mxu3 }
 0x226   : > { %v1045_v16 = vadd.f32 %v1044_v11, %v884_v4  ;;  %v1074_v22 = vadd.f32 %v1073_v12, %v885_v32 }
 0x227   : > { %v1063_v56 = vpop.f32.mrf.mxu1  ;;  %v1034_v31 = vpop.f32.mrf.mxu0 }
 0x228   : > { %v1112_v24 = vpack.c.bf16 %v1074_v22, %v1072_v17  ;;  %v1108_v25 = vpack.c.bf16 %v1045_v16, %v1043_v13  ;;  %v1064_v34 = vadd.f32 %v1063_v56, %v885_v32  ;;  %v1035_v51 = vadd.f32 %v1034_v31, %v884_v4 }
 0x22a   : > { %1117 = vmatpush.bf16.xpose.msrb.mxu3 %v1112_v24  ;;  %v1110_v43 = vpack.c.bf16 %v1064_v34, %v1062_v36  ;;  %v1106_v53 = vpack.c.bf16 %v1035_v51, %v1033_v52 }
 0x22d   : > { %v1085_v15 = vpop.f32.mrf.mxu2 }
 0x22e   : > { %v1086_v33 = vadd.f32 %v1085_v15, %v886_v26 }
 0x232   : > { %1118 = vmatpush.bf16.xpose.msrb.mxu3 %v1111_v29 }
 0x235   : > { %v1087_v35 = vpop.f32.mrf.mxu2 }
 0x236   : > { %v1088_v38 = vadd.f32 %v1087_v35, %v886_v26 }
 0x238   : > { %v1243_v39 = vpack.c.bf16 %v1088_v38, %v1086_v33 }
 0x23a   : > { %1119 = vmatpush.bf16.xpose.msrb.mxu3 %v1110_v43 }
 0x23d   : > { %v1090_v44 = vpop.f32.mrf.mxu2 }
 0x23e   : > { %v1091_v63 = vadd.f32 %v1090_v44, %v886_v26 }
 0x242   : > { %1120 = vmatpush.bf16.xpose.msrb.mxu3 %v1109_v19 }
 0x245   : > { %v1092_v47 = vpop.f32.mrf.mxu2 }
 0x246   : > { %v1093_v55 = vadd.f32 %v1092_v47, %v886_v26 }
 0x248   : > { %v1244_v41 = vpack.c.bf16 %v1093_v55, %v1091_v63 }
 0x249   : > { %1121 = vmatmul.bf16.vlgmr.msrb.gmra.mxu3 %v1105_v49 }
 0x24d   : > { %v1095_v50 = vpop.f32.mrf.mxu2 }
 0x24e   : > { %v1096_v62 = vadd.f32 %v1095_v50, %v886_v26 }
 0x255   : > { %v1097_v18 = vpop.f32.mrf.mxu2 }
 0x256   : > { %v1098_v61 = vadd.f32 %v1097_v18, %v886_v26 }
 0x258   : > { %v1245_v0 = vpack.c.bf16 %v1098_v61, %v1096_v62 }
 0x259   : > { %1126 = vmatmul.bf16.gmra.mxu3 %v1106_v53 }
 0x25d   : > { %v1100_v20 = vpop.f32.mrf.mxu2 }
 0x25e   : > { %v1101_v59 = vadd.f32 %v1100_v20, %v886_v26 }
 0x265   : > { %v1102_v54 = vpop.f32.mrf.mxu2 }
 0x266   : > { %v1103_v60 = vadd.f32 %v1102_v54, %v886_v26 }
 0x268   : > { %v1246_v21 = vpack.c.bf16 %v1103_v60, %v1101_v59 }
 0x269   : > { %1131 = vmatmul.bf16.gmra.mxu3 %v1107_v3 }
 0x26a   : > { %1263 = vmatpush.bf16.msrb.mxu0 %v1246_v21 }
 0x26e   : > { %1264 = vmatpush.bf16.msrb.mxu0 %v1245_v0 }
 0x272   : > { %1265 = vmatpush.bf16.msrb.mxu0 %v1244_v41 }
 0x276   : > { %1266 = vmatpush.bf16.msrb.mxu0 %v1243_v39 }
 0x279   : > { %1136 = vmatmul.bf16.gmra.mxu3 %v1108_v25 }
 0x2cc   : > { %v1122_v45 = vpop.f32.mrf.mxu3 }
 0x2cd   : > { %v1142_v1 = vmul.f32 0.088388346, %v1122_v45 }
 0x2cf   : > { %v1151_v4 = vsel %vm1150_vm9, %v1142_v1, -inf }
 0x2d0   : > { %1152 = vmax.xlane.f32.xlu1 %v1151_v4 }
 0x2d4   : > { %v1124_v58 = vpop.f32.mrf.mxu3 }
 0x2d5   : > { %v1143_v57 = vmul.f32 0.088388346, %v1124_v58 }
 0x2d7   : > { %v1154_v5 = vsel %vm1150_vm9, %v1143_v57, -inf }
 0x2d8   : > { %1155 = vmax.xlane.f32.xlu2 %v1154_v5 }
 0x2dc   : > { %v1127_v6 = vpop.f32.mrf.mxu3 }
 0x2dd   : > { %v1144_v7 = vmul.f32 0.088388346, %v1127_v6 }
 0x2df   : > { %v1157_v3 = vsel %vm1150_vm9, %v1144_v7, -inf }
 0x2e0   : > { %1158 = vmax.xlane.f32.xlu0 %v1157_v3 }
 0x2e4   : > { %v1129_v8 = vpop.f32.mrf.mxu3 }
 0x2e5   : > { %v1145_v9 = vmul.f32 0.088388346, %v1129_v8 }
 0x2e7   : > { %v1160_v10 = vsel %vm1150_vm9, %v1145_v9, -inf }
 0x2e8   : > { %1161 = vmax.xlane.f32.xlu1 %v1160_v10 }
 0x2ec   : > { %v1132_v32 = vpop.f32.mrf.mxu3 }
 0x2ed   : > { %v1146_v11 = vmul.f32 0.088388346, %v1132_v32 }
 0x2ef   : > { %v1163_v12 = vsel %vm1150_vm9, %v1146_v11, -inf }
 0x2f0   : > { %1164 = vmax.xlane.f32.xlu2 %v1163_v12 }
 0x2f4   : > { %v1134_v13 = vpop.f32.mrf.mxu3 }
 0x2f5   : > { %v1147_v17 = vmul.f32 0.088388346, %v1134_v13 }
 0x2f7   : > { %v1166_v16 = vsel %vm1150_vm9, %v1147_v17, -inf }
 0x2f8   : > { %1167 = vmax.xlane.f32.xlu0 %v1166_v16  ;;  %v2474_v16 = vld [vmem:[#allocation14 + $0x30] sm:$0xff] }
 0x2fc   : > { %v1137_v22 = vpop.f32.mrf.mxu3 }
 0x2fd   : > { %v1148_v23 = vmul.f32 0.088388346, %v1137_v22 }
 0x2ff   : > { %v1169_v24 = vsel %vm1150_vm9, %v1148_v23, -inf }
 0x300   : > { %1170 = vmax.xlane.f32.xlu1 %v1169_v24 }
 0x304   : > { %v1139_v25 = vpop.f32.mrf.mxu3 }
 0x305   : > { %v1149_v26 = vmul.f32 0.088388346, %v1139_v25  ;;  %v2472_v25 = vld [vmem:[#allocation14 + $0x20] sm:$0xff] }
 0x307   : > { %v1172_v27 = vsel %vm1150_vm9, %v1149_v26, -inf }
 0x308   : > { %1173 = vmax.xlane.f32.xlu2 %v1172_v27 }
 0x343   : > { %v1153_v15 = vpop.xlane.xlu1 %1152 }
 0x344   : > { %v1175_v28 = vsub.f32 %v1142_v1, %v1153_v15 }
 0x346   : > { %v1183_v33 = vmul.f32 1.442695, %v1175_v28 }
 0x348   : > { %2748 = vpow2.f32 %v1183_v33  ;;  %v2471_v33 = vld [vmem:[#allocation14 + $0x18] sm:$0xff] }
 0x34b   : > { %v1156_v29 = vpop.xlane.xlu2 %1155 }
 0x34c   : > { %v1176_v56 = vsub.f32 %v1143_v57, %v1156_v29 }
 0x34e   : > { %v2749_v30 = vpop.eup %2748  ;;  %v1185_v34 = vmul.f32 1.442695, %v1176_v56 }
 0x34f   : > { %v1199_v35 = vsel %vm1150_vm9, %v2749_v30, 0.0 }
 0x350   : > { %2750 = vpow2.f32 %v1185_v34  ;;  %1200 = vadd.xlane.f32.xlu0 %v1199_v35 }
 0x353   : > { %v1159_v36 = vpop.xlane.xlu0 %1158 }
 0x354   : > { %v1177_v38 = vsub.f32 %v1144_v7, %v1159_v36 }
 0x356   : > { %v2751_v43 = vpop.eup %2750  ;;  %v1187_v39 = vmul.f32 1.442695, %v1177_v38 }
 0x357   : > { %v1202_v40 = vsel %vm1150_vm9, %v2751_v43, 0.0 }
 0x358   : > { %2752 = vpow2.f32 %v1187_v39  ;;  %1203 = vadd.xlane.f32.xlu1 %v1202_v40  ;;  %v2469_v39 = vld [vmem:[#allocation14 + $0x8] sm:$0xff]  ;;  %v2468_v40 = vld [vmem:[#allocation14] sm:$0xff] }
 0x35b   : > { %v1162_v42 = vpop.xlane.xlu1 %1161 }
 0x35c   : > { %v1178_v44 = vsub.f32 %v1145_v9, %v1162_v42 }
 0x35e   : > { %v2753_v46 = vpop.eup %2752  ;;  %v1189_v19 = vmul.f32 1.442695, %v1178_v44 }
 0x35f   : > { %v1205_v2 = vsel %vm1150_vm9, %v2753_v46, 0.0 }
 0x360   : > { %2754 = vpow2.f32 %v1189_v19  ;;  %1206 = vadd.xlane.f32.xlu2 %v1205_v2 }
 0x363   : > { %v1165_v37 = vpop.xlane.xlu2 %1164 }
 0x364   : > { %v1179_v47 = vsub.f32 %v1146_v11, %v1165_v37 }
 0x366   : > { %v2755_v48 = vpop.eup %2754  ;;  %v1191_v49 = vmul.f32 1.442695, %v1179_v47 }
 0x367   : > { %v1208_v50 = vsel %vm1150_vm9, %v2755_v48, 0.0 }
 0x368   : > { %2756 = vpow2.f32 %v1191_v49  ;;  %1209 = vadd.xlane.f32.xlu0 %v1208_v50 }
 0x36b   : > { %v1168_v31 = vpop.xlane.xlu0 %1167 }
 0x36c   : > { %v1180_v51 = vsub.f32 %v1147_v17, %v1168_v31  ;;  %v2475_v17 = vld [vmem:[#allocation14 + $0x38] sm:$0xff] }
 0x36d   : > { %1376 = vmatpush.bf16.msrb.mxu1 %v2475_v17 }
 0x36e   : > { %v2757_v52 = vpop.eup %2756  ;;  %v1193_v18 = vmul.f32 1.442695, %v1180_v51 }
 0x36f   : > { %v1211_v53 = vsel %vm1150_vm9, %v2757_v52, 0.0 }
 0x370   : > { %2758 = vpow2.f32 %v1193_v18  ;;  %1212 = vadd.xlane.f32.xlu1 %v1211_v53 }
 0x371   : > { %1377 = vmatpush.bf16.msrb.mxu1 %v2474_v16  ;;  %v2803_v16 = vld [vmem:[%s3517_s1 + $0x38] sm:$0xff] }
 0x373   : > { %v1171_v20 = vpop.xlane.xlu1 %1170 }
 0x374   : > { %v1181_v54 = vsub.f32 %v1148_v23, %v1171_v20  ;;  %v2473_v23 = vld [vmem:[#allocation14 + $0x28] sm:$0xff]  ;;  %v2796_v20 = vld [vmem:[%s3517_s1] sm:$0xff] }
 0x375   : > { %1378 = vmatpush.bf16.msrb.mxu1 %v2473_v23 }
 0x376   : > { %v2759_v59 = vpop.eup %2758  ;;  %v1195_v60 = vmul.f32 1.442695, %v1181_v54 }
 0x377   : > { %v1214_v61 = vsel %vm1150_vm9, %v2759_v59, 0.0 }
 0x378   : > { %2760 = vpow2.f32 %v1195_v60  ;;  %1215 = vadd.xlane.f32.xlu2 %v1214_v61  ;;  %v2797_v61 = vld [vmem:[%s3517_s1 + $0x8] sm:$0xff] }
 0x379   : > { %1379 = vmatpush.bf16.msrb.mxu1 %v2472_v25 }
 0x37b   : > { %v1174_v21 = vpop.xlane.xlu2 %1173 }
 0x37c   : > { %v1182_v62 = vsub.f32 %v1149_v26, %v1174_v21 }
 0x37d   : > { %1380 = vmatpush.bf16.msrb.mxu1 %v2471_v33 }
 0x37e   : > { %v2761_v55 = vpop.eup %2760  ;;  %v1197_v0 = vmul.f32 1.442695, %v1182_v62 }
 0x37f   : > { %v1217_v63 = vsel %vm1150_vm9, %v2761_v55, 0.0 }
 0x380   : > { %2762 = vpow2.f32 %v1197_v0  ;;  %1218 = vadd.xlane.f32.xlu0 %v1217_v63  ;;  %v2798_v0 = vld [vmem:[%s3517_s1 + $0x10] sm:$0xff] }
 0x386   : > { %v2763_v41 = vpop.eup %2762 }
 0x387   : > { %v1220_v45 = vsel %vm1150_vm9, %v2763_v41, 0.0 }
 0x388   : > { %1221 = vadd.xlane.f32.xlu1 %v1220_v45 }
 0x3c3   : > { %v1201_v1 = vpop.xlane.xlu0 %1200 }
 0x3c4   : > { %2764 = vrcp.f32 %v1201_v1  ;;  %v2799_v1 = vld [vmem:[%s3517_s1 + $0x18] sm:$0xff] }
 0x3ca   : > { %v2765_v58 = vpop.eup %2764 }
 0x3cb   : > { %v1204_v4 = vpop.xlane.xlu1 %1203  ;;  %v1231_v5 = vmul.f32 %v2765_v58, %v2749_v30 }
 0x3cc   : > { %2766 = vrcp.f32 %v1204_v4 }
 0x3d2   : > { %v2767_v57 = vpop.eup %2766 }
 0x3d3   : > { %v1232_v6 = vmul.f32 %v2767_v57, %v2751_v43  ;;  %v1207_v3 = vpop.xlane.xlu2 %1206  ;;  %v2470_v43 = vld [vmem:[#allocation14 + $0x10] sm:$0xff] }
 0x3d4   : > { %2768 = vrcp.f32 %v1207_v3  ;;  %1381 = vmatpush.bf16.msrb.mxu1 %v2470_v43 }
 0x3d5   : > { %v1239_v7 = vpack.c.bf16 %v1232_v6, %v1231_v5  ;;  %v2800_v5 = vld [vmem:[%s3517_s1 + $0x20] sm:$0xff] }
 0x3d7   : > { %2320 = vmatmul.msk.bf16.vlgmr.msrb.gmra.mxu0 %vm1150_vm9, %v1239_v7 }
 0x3d8   : > { %1382 = vmatpush.bf16.msrb.mxu1 %v2469_v39 }
 0x3da   : > { %v2769_v9 = vpop.eup %2768 }
 0x3db   : > { %v1210_v8 = vpop.xlane.xlu0 %1209  ;;  %v1233_v32 = vmul.f32 %v2769_v9, %v2753_v46 }
 0x3dc   : > { %2770 = vrcp.f32 %v1210_v8  ;;  %1383 = vmatpush.bf16.msrb.mxu1 %v2468_v40  ;;  %v2801_v8 = vld [vmem:[%s3517_s1 + $0x28] sm:$0xff] }
 0x3e2   : > { %v2771_v10 = vpop.eup %2770 }
 0x3e3   : > { %v1234_v11 = vmul.f32 %v2771_v10, %v2755_v48  ;;  %v1213_v13 = vpop.xlane.xlu1 %1212 }
 0x3e4   : > { %2772 = vrcp.f32 %v1213_v13 }
 0x3e5   : > { %v1240_v12 = vpack.c.bf16 %v1234_v11, %v1233_v32  ;;  %v2802_v11 = vld [vmem:[%s3517_s1 + $0x30] sm:$0xff] }
 0x3e7   : > { %2321 = vmatmul.msk.bf16.gmra.mxu0 %vm1150_vm9, %v1240_v12 }
 0x3ea   : > { %v2773_v24 = vpop.eup %2772 }
 0x3eb   : > { %v1216_v22 = vpop.xlane.xlu2 %1215  ;;  %v1235_v27 = vmul.f32 %v2773_v24, %v2757_v52  ;;  %v2727_v52 = vld [vmem:[#allocation15] ss:$0 sm:$0xff] }
 0x3ec   : > { %2774 = vrcp.f32 %v1216_v22 }
 0x3f2   : > { %v2775_v26 = vpop.eup %2774 }
 0x3f3   : > { %v1236_v15 = vmul.f32 %v2775_v26, %v2759_v59  ;;  %v1219_v29 = vpop.xlane.xlu0 %1218 }
 0x3f4   : > { %2776 = vrcp.f32 %v1219_v29 }
 0x3f5   : > { %v1241_v28 = vpack.c.bf16 %v1236_v15, %v1235_v27 }
 0x3f7   : > { %2322 = vmatmul.msk.bf16.gmra.mxu0 %vm1150_vm9, %v1241_v28 }
 0x3fa   : > { %v2777_v30 = vpop.eup %2776 }
 0x3fb   : > { %v1222_v56 = vpop.xlane.xlu1 %1221  ;;  %v1237_v35 = vmul.f32 %v2777_v30, %v2761_v55 }
 0x3fc   : > { %2778 = vrcp.f32 %v1222_v56 }
 0x402   : > { %v2779_v34 = vpop.eup %2778 }
 0x403   : > { %v1238_v36 = vmul.f32 %v2779_v34, %v2763_v41 }
 0x405   : > { %v1242_v38 = vpack.c.bf16 %v1238_v36, %v1237_v35 }
 0x407   : > { %2323 = vmatmul.msk.bf16.gmra.mxu0 %vm1150_vm9, %v1242_v38 }
 0x454   : > { %v1268_v42 = vpop.f32.mrf.mxu0 }
 0x45c   : > { %v1270_v44 = vpop.f32.mrf.mxu0 }
 0x45d   : > { %v1304_v46 = vpack.c.bf16 %v1270_v44, %v1268_v42 }
 0x45f   : > { %1384 = vmatmul.bf16.vlgmr.msrb.gmra.mxu1 %v1304_v46 }
 0x464   : > { %v1273_v19 = vpop.f32.mrf.mxu0 }
 0x46c   : > { %v1275_v2 = vpop.f32.mrf.mxu0 }
 0x46d   : > { %v1305_v37 = vpack.c.bf16 %v1275_v2, %v1273_v19 }
 0x46f   : > { %1389 = vmatmul.bf16.gmra.mxu1 %v1305_v37 }
 0x474   : > { %v1278_v47 = vpop.f32.mrf.mxu0 }
 0x47c   : > { %v1280_v48 = vpop.f32.mrf.mxu0 }
 0x47d   : > { %v1306_v49 = vpack.c.bf16 %v1280_v48, %v1278_v47 }
 0x47f   : > { %1394 = vmatmul.bf16.gmra.mxu1 %v1306_v49 }
 0x484   : > { %v1283_v50 = vpop.f32.mrf.mxu0 }
 0x48c   : > { %v1285_v31 = vpop.f32.mrf.mxu0 }
 0x48d   : > { %v1307_v51 = vpack.c.bf16 %v1285_v31, %v1283_v50 }
 0x48f   : > { %1399 = vmatmul.bf16.gmra.mxu1 %v1307_v51 }
 0x4dc   : > { %v1385_v18 = vpop.f32.mrf.mxu1 }
 0x4dd   : > { %v1386_v53 = vadd.f32 %v2727_v52, %v1385_v18 }
 0x4df   : > { %v1405_v54 = vadd.f32 %v2796_v20, %v1386_v53 }
 0x4e1   : > { %1413 = vst [vmem:[#allocation3 + $0x30] sm:$0xff] %v1405_v54  ;;  %1423 = vadd.xlane.f32.xlu2 %v1405_v54 }
 0x4e4   : > { %v1387_v59 = vpop.f32.mrf.mxu1 }
 0x4e5   : > { %v1388_v60 = vadd.f32 %v2727_v52, %v1387_v59 }
 0x4e7   : > { %v1406_v21 = vadd.f32 %v2797_v61, %v1388_v60 }
 0x4e9   : > { %1414 = vst [vmem:[#allocation3] sm:$0xff] %v1406_v21  ;;  %1425 = vadd.xlane.f32.xlu0 %v1406_v21 }
 0x4ec   : > { %v1390_v62 = vpop.f32.mrf.mxu1 }
 0x4ed   : > { %v1391_v55 = vadd.f32 %v2727_v52, %v1390_v62 }
 0x4ef   : > { %v1407_v63 = vadd.f32 %v2798_v0, %v1391_v55 }
 0x4f1   : > { %1415 = vst [vmem:[#allocation3 + $0x18] sm:$0xff] %v1407_v63  ;;  %1427 = vadd.xlane.f32.xlu1 %v1407_v63 }
 0x4f4   : > { %v1392_v41 = vpop.f32.mrf.mxu1 }
 0x4f5   : > { %v1393_v45 = vadd.f32 %v2727_v52, %v1392_v41 }
 0x4f7   : > { %v1408_v4 = vadd.f32 %v2799_v1, %v1393_v45 }
 0x4f9   : > { %1416 = vst [vmem:[#allocation3 + $0x10] sm:$0xff] %v1408_v4  ;;  %1429 = vadd.xlane.f32.xlu2 %v1408_v4 }
 0x4fc   : > { %v1395_v58 = vpop.f32.mrf.mxu1 }
 0x4fd   : > { %v1396_v57 = vadd.f32 %v2727_v52, %v1395_v58 }
 0x4ff   : > { %v1409_v6 = vadd.f32 %v2800_v5, %v1396_v57 }
 0x501   : > { %1417 = vst [vmem:[#allocation3 + $0x8] sm:$0xff] %v1409_v6  ;;  %1431 = vadd.xlane.f32.xlu0 %v1409_v6 }
 0x504   : > { %v1397_v7 = vpop.f32.mrf.mxu1 }
 0x505   : > { %v1398_v3 = vadd.f32 %v2727_v52, %v1397_v7 }
 0x507   : > { %v1410_v9 = vadd.f32 %v2801_v8, %v1398_v3 }
 0x509   : > { %1418 = vst [vmem:[#allocation3 + $0x20] sm:$0xff] %v1410_v9  ;;  %1433 = vadd.xlane.f32.xlu1 %v1410_v9 }
 0x50c   : > { %v1400_v10 = vpop.f32.mrf.mxu1 }
 0x50d   : > { %v1401_v32 = vadd.f32 %v2727_v52, %v1400_v10 }
 0x50f   : > { %v1411_v12 = vadd.f32 %v2802_v11, %v1401_v32  ;;  %v3833_v32 = vld [vmem:[%s4038_s2] ss:$0 sm:$0xff] }
 0x511   : > { %1419 = vst [vmem:[#allocation3 + $0x28] sm:$0xff] %v1411_v12  ;;  %1435 = vadd.xlane.f32.xlu2 %v1411_v12 }
 0x514   : > { %v1402_v13 = vpop.f32.mrf.mxu1 }
 0x515   : > { %v1403_v17 = vadd.f32 %v2727_v52, %v1402_v13 }
 0x517   : > { %v1412_v22 = vadd.f32 %v2803_v16, %v1403_v17 }
 0x519   : > { %1420 = vst [vmem:[#allocation3 + $0x38] sm:$0xff] %v1412_v22  ;;  %1437 = vadd.xlane.f32.xlu0 %v1412_v22 }
 0x554   : > { %v1424_v23 = vpop.xlane.xlu2 %1423 }
 0x555   : > { %v1439_v24 = vmul.f32 %v1424_v23, %v3563_v14  ;;  %v3839_v23 = vld [vmem:[%s4039_s7] ss:$0 sm:$0xff] }
 0x557   : > { %v3787_v25 = vsub.f32 %v1405_v54, %v1439_v24 }
 0x559   : > { %v1455_v26 = vmul.f32 %v3787_v25, %v3787_v25 }
 0x55b   : > { %1463 = vadd.xlane.f32.xlu1 %v1455_v26 }
 0x55c   : > { %v1426_v27 = vpop.xlane.xlu0 %1425 }
 0x55d   : > { %v1440_v15 = vmul.f32 %v1426_v27, %v3563_v14 }
 0x55f   : > { %v3792_v28 = vsub.f32 %v1406_v21, %v1440_v15 }
 0x561   : > { %v1456_v33 = vmul.f32 %v3792_v28, %v3792_v28 }
 0x563   : > { %1465 = vadd.xlane.f32.xlu2 %v1456_v33 }
 0x564   : > { %v1428_v29 = vpop.xlane.xlu1 %1427 }
 0x565   : > { %v1441_v56 = vmul.f32 %v1428_v29, %v3563_v14 }
 0x567   : > { %v3797_v30 = vsub.f32 %v1407_v63, %v1441_v56 }
 0x569   : > { %v1457_v34 = vmul.f32 %v3797_v30, %v3797_v30 }
 0x56b   : > { %1467 = vadd.xlane.f32.xlu0 %v1457_v34 }
 0x56c   : > { %v1430_v35 = vpop.xlane.xlu2 %1429 }
 0x56d   : > { %v1442_v36 = vmul.f32 %v1430_v35, %v3563_v14 }
 0x56f   : > { %v3802_v38 = vsub.f32 %v1408_v4, %v1442_v36 }
 0x571   : > { %v1458_v43 = vmul.f32 %v3802_v38, %v3802_v38 }
 0x573   : > { %1469 = vadd.xlane.f32.xlu1 %v1458_v43 }
 0x574   : > { %v1432_v39 = vpop.xlane.xlu0 %1431 }
 0x575   : > { %v1443_v40 = vmul.f32 %v1432_v39, %v3563_v14 }
 0x577   : > { %v3807_v42 = vsub.f32 %v1409_v6, %v1443_v40 }
 0x579   : > { %v1459_v44 = vmul.f32 %v3807_v42, %v3807_v42 }
 0x57b   : > { %1471 = vadd.xlane.f32.xlu2 %v1459_v44 }
 0x57c   : > { %v1434_v46 = vpop.xlane.xlu1 %1433 }
 0x57d   : > { %v1444_v19 = vmul.f32 %v1434_v46, %v3563_v14 }
 0x57f   : > { %v3812_v2 = vsub.f32 %v1410_v9, %v1444_v19 }
 0x581   : > { %v1460_v37 = vmul.f32 %v3812_v2, %v3812_v2 }
 0x583   : > { %1473 = vadd.xlane.f32.xlu0 %v1460_v37 }
 0x584   : > { %v1436_v47 = vpop.xlane.xlu2 %1435 }
 0x585   : > { %v1445_v48 = vmul.f32 %v1436_v47, %v3563_v14 }
 0x587   : > { %v3817_v49 = vsub.f32 %v1411_v12, %v1445_v48 }
 0x589   : > { %v1461_v50 = vmul.f32 %v3817_v49, %v3817_v49 }
 0x58b   : > { %1475 = vadd.xlane.f32.xlu1 %v1461_v50 }
 0x58c   : > { %v1438_v31 = vpop.xlane.xlu0 %1437 }
 0x58d   : > { %v1446_v51 = vmul.f32 %v1438_v31, %v3563_v14 }
 0x58f   : > { %v3822_v52 = vsub.f32 %v1412_v22, %v1446_v51 }
 0x591   : > { %v1462_v18 = vmul.f32 %v3822_v52, %v3822_v52 }
 0x593   : > { %1477 = vadd.xlane.f32.xlu2 %v1462_v18 }
 0x5ce   : > { %v1464_v53 = vpop.xlane.xlu1 %1463 }
 0x5cf   : > { %v1479_v20 = vmul.f32 %v1464_v53, %v3563_v14 }
 0x5d1   : > { %v1487_v54 = vadd.f32 1e-06, %v1479_v20 }
 0x5d3   : > { %2780 = vrsqrt.f32 %v1487_v54  ;;  %vm1501_vm11 = vweird.f32 %v1487_v54 }
 0x5d6   : > { %v1466_v59 = vpop.xlane.xlu2 %1465 }
 0x5d7   : > { %v1480_v60 = vmul.f32 %v1466_v59, %v3563_v14 }
 0x5d9   : > { %v2781_v61 = vpop.eup %2780  ;;  %v1488_v21 = vadd.f32 1e-06, %v1480_v60 }
 0x5da   : > { %v1496_v62 = vmul.f32 %v2781_v61, %v1487_v54  ;;  %vm1502_vm10 = vweird.f32 %v2781_v61 }
 0x5db   : > { %2782 = vrsqrt.f32 %v1488_v21  ;;  %vm1503_vm12 = vmor %vm1501_vm11, %vm1502_vm10  ;;  %vm1511_vm14 = vweird.f32 %v1488_v21 }
 0x5dc   : > { %v1497_v55 = vmul.f32 %v2781_v61, %v1496_v62 }
 0x5de   : > { %v1498_v0 = vmul.f32 0.5, %v1497_v55  ;;  %v1468_v63 = vpop.xlane.xlu0 %1467 }
 0x5df   : > { %v1481_v41 = vmul.f32 %v1468_v63, %v3563_v14 }
 0x5e0   : > { %v1499_v45 = vsub.f32 1.5, %v1498_v0 }
 0x5e1   : > { %v2783_v1 = vpop.eup %2782  ;;  %v1489_v4 = vadd.f32 1e-06, %v1481_v41 }
 0x5e2   : > { %v1500_v58 = vmul.f32 %v2781_v61, %v1499_v45  ;;  %v1506_v57 = vmul.f32 %v2783_v1, %v1488_v21  ;;  %vm1512_vm13 = vweird.f32 %v2783_v1 }
 0x5e3   : > { %2784 = vrsqrt.f32 %v1489_v4  ;;  %vm1513_vm15 = vmor %vm1511_vm14, %vm1512_vm13  ;;  %vm1521_vm1 = vweird.f32 %v1489_v4 }
 0x5e4   : > { %v1507_v5 = vmul.f32 %v2783_v1, %v1506_v57  ;;  %v1504_v6 = vsel %vm1503_vm12, %v2781_v61, %v1500_v58 }
 0x5e5   : > { %v1575_v11 = vmul.f32 %v1504_v6, %v3787_v25  ;;  %v3214_v6 = vmov 0.0  }
 0x5e6   : > { %v1508_v7 = vmul.f32 0.5, %v1507_v5  ;;  %v1470_v3 = vpop.xlane.xlu1 %1469  ;;  %1621 = vst [vmem:[#allocation5 + $0x8] sm:$0xff] %v3214_v6 }
 0x5e7   : > { %v1482_v8 = vmul.f32 %v1470_v3, %v3563_v14  ;;  %v1586_v24 = vmul.f32 %v3833_v32, %v1575_v11  ;;  %1622 = vst [vmem:[#allocation5 + $0x10] sm:$0xff] %v3214_v6 }
 0x5e8   : > { %v1509_v9 = vsub.f32 1.5, %v1508_v7  ;;  %1623 = vst [vmem:[#allocation5] sm:$0xff] %v3214_v6 }
 0x5e9   : > { %v2785_v10 = vpop.eup %2784  ;;  %v1490_v12 = vadd.f32 1e-06, %v1482_v8  ;;  %v1597_v34 = vadd.f32 %v3839_v23, %v1586_v24  ;;  %1624 = vst [vmem:[#allocation5 + $0x18] sm:$0xff] %v3214_v6 }
 0x5ea   : > { %v1510_v13 = vmul.f32 %v2783_v1, %v1509_v9  ;;  %v1516_v17 = vmul.f32 %v2785_v10, %v1489_v4  ;;  %vm1522_vm0 = vweird.f32 %v2785_v10  ;;  %1625 = vst [vmem:[#allocation5 + $0x28] sm:$0xff] %v3214_v6 }
 0x5eb   : > { %2786 = vrsqrt.f32 %v1490_v12  ;;  %vm1523_vm2 = vmor %vm1521_vm1, %vm1522_vm0  ;;  %vm1531_vm4 = vweird.f32 %v1490_v12  ;;  %1626 = vst [vmem:[#allocation5 + $0x30] sm:$0xff] %v3214_v6 }
 0x5ec   : > { %v1514_v16 = vsel %vm1513_vm15, %v2783_v1, %v1510_v13  ;;  %v1517_v22 = vmul.f32 %v2785_v10, %v1516_v17  ;;  %1627 = vst [vmem:[#allocation5 + $0x20] sm:$0xff] %v3214_v6 }
 0x5ed   : > { %v1576_v26 = vmul.f32 %v1514_v16, %v3792_v28  ;;  %1628 = vst [vmem:[#allocation5 + $0x38] sm:$0xff] %v3214_v6 }
 0x5ee   : > { %v1518_v27 = vmul.f32 0.5, %v1517_v22  ;;  %v1472_v15 = vpop.xlane.xlu2 %1471 }
 0x5ef   : > { %v1587_v25 = vmul.f32 %v3833_v32, %v1576_v26  ;;  %v1483_v33 = vmul.f32 %v1472_v15, %v3563_v14 }
 0x5f0   : > { %v1519_v29 = vsub.f32 1.5, %v1518_v27 }
 0x5f1   : > { %v2787_v56 = vpop.eup %2786  ;;  %v1598_v35 = vadd.f32 %v3839_v23, %v1587_v25  ;;  %v1491_v36 = vadd.f32 1e-06, %v1483_v33 }
 0x5f2   : > { %v1520_v43 = vmul.f32 %v2785_v10, %v1519_v29  ;;  %v1526_v39 = vmul.f32 %v2787_v56, %v1490_v12  ;;  %vm1532_vm3 = vweird.f32 %v2787_v56 }
 0x5f3   : > { %v2500_v40 = vpack.c.bf16 %v1598_v35, %v1597_v34  ;;  %2788 = vrsqrt.f32 %v1491_v36  ;;  %vm1533_vm5 = vmor %vm1531_vm4, %vm1532_vm3  ;;  %vm1541_vm7 = vweird.f32 %v1491_v36 }
 0x5f4   : > { %v1527_v28 = vmul.f32 %v2787_v56, %v1526_v39  ;;  %v1524_v44 = vsel %vm1523_vm2, %v2785_v10, %v1520_v43 }
 0x5f5   : > { %2501 = vst [vmem:[#allocation4] sm:$0xff] %v2500_v40   ;;  %v1577_v50 = vmul.f32 %v1524_v44, %v3797_v30 }
 0x5f6   : > { %v1528_v46 = vmul.f32 0.5, %v1527_v28  ;;  %v1474_v19 = vpop.xlane.xlu0 %1473 }
 0x5f7   : > { %v1484_v37 = vmul.f32 %v1474_v19, %v3563_v14  ;;  %v1588_v54 = vmul.f32 %v3833_v32, %v1577_v50 }
 0x5f8   : > { %v1529_v47 = vsub.f32 1.5, %v1528_v46 }
 0x5f9   : > { %v2789_v48 = vpop.eup %2788  ;;  %v1492_v31 = vadd.f32 1e-06, %v1484_v37  ;;  %v1599_v0 = vadd.f32 %v3839_v23, %v1588_v54 }
 0x5fa   : > { %v1530_v51 = vmul.f32 %v2787_v56, %v1529_v47  ;;  %v1536_v18 = vmul.f32 %v2789_v48, %v1491_v36  ;;  %vm1542_vm6 = vweird.f32 %v2789_v48 }
 0x5fb   : > { %2790 = vrsqrt.f32 %v1492_v31  ;;  %vm1543_vm8 = vmor %vm1541_vm7, %vm1542_vm6  ;;  %vm1551_vm10 = vweird.f32 %v1492_v31 }
 0x5fc   : > { %v1534_v53 = vsel %vm1533_vm5, %v2787_v56, %v1530_v51  ;;  %v1537_v20 = vmul.f32 %v2789_v48, %v1536_v18 }
 0x5fd   : > { %v1578_v59 = vmul.f32 %v1534_v53, %v3802_v38 }
 0x5fe   : > { %v1538_v60 = vmul.f32 0.5, %v1537_v20  ;;  %v1476_v61 = vpop.xlane.xlu1 %1475 }
 0x5ff   : > { %v1589_v21 = vmul.f32 %v3833_v32, %v1578_v59  ;;  %v1485_v62 = vmul.f32 %v1476_v61, %v3563_v14 }
 0x600   : > { %v1539_v55 = vsub.f32 1.5, %v1538_v60 }
 0x601   : > { %v2791_v30 = vpop.eup %2790  ;;  %v1600_v63 = vadd.f32 %v3839_v23, %v1589_v21  ;;  %v1493_v41 = vadd.f32 1e-06, %v1485_v62 }
 0x602   : > { %v1540_v45 = vmul.f32 %v2789_v48, %v1539_v55  ;;  %v1546_v1 = vmul.f32 %v2791_v30, %v1492_v31  ;;  %vm1552_vm9 = vweird.f32 %v2791_v30 }
 0x603   : > { %v2505_v4 = vpack.c.bf16 %v1600_v63, %v1599_v0  ;;  %2792 = vrsqrt.f32 %v1493_v41  ;;  %vm1553_vm11 = vmor %vm1551_vm10, %vm1552_vm9  ;;  %vm1561_vm13 = vweird.f32 %v1493_v41 }
 0x604   : > { %v1547_v38 = vmul.f32 %v2791_v30, %v1546_v1  ;;  %v1544_v58 = vsel %vm1543_vm8, %v2789_v48, %v1540_v45 }
 0x605   : > { %2517 = vst [vmem:[#allocation4 + $0x18] sm:$0xff] %v2505_v4   ;;  %v1579_v9 = vmul.f32 %v1544_v58, %v3807_v42 }
 0x606   : > { %v1548_v57 = vmul.f32 0.5, %v1547_v38  ;;  %v1478_v5 = vpop.xlane.xlu2 %1477 }
 0x607   : > { %v1486_v7 = vmul.f32 %v1478_v5, %v3563_v14  ;;  %v1590_v14 = vmul.f32 %v3833_v32, %v1579_v9 }
 0x608   : > { %v1549_v3 = vsub.f32 1.5, %v1548_v57 }
 0x609   : > { %v2793_v8 = vpop.eup %2792  ;;  %v1494_v10 = vadd.f32 1e-06, %v1486_v7  ;;  %v1601_v27 = vadd.f32 %v3839_v23, %v1590_v14 }
 0x60a   : > { %v1550_v11 = vmul.f32 %v2791_v30, %v1549_v3  ;;  %v1556_v12 = vmul.f32 %v2793_v8, %v1493_v41  ;;  %vm1562_vm12 = vweird.f32 %v2793_v8 }
 0x60b   : > { %2794 = vrsqrt.f32 %v1494_v10  ;;  %vm1563_vm14 = vmor %vm1561_vm13, %vm1562_vm12  ;;  %vm1571_vm0 = vweird.f32 %v1494_v10 }
 0x60c   : > { %v1554_v13 = vsel %vm1553_vm11, %v2791_v30, %v1550_v11  ;;  %v1557_v17 = vmul.f32 %v2793_v8, %v1556_v12 }
 0x60d   : > { %v1580_v16 = vmul.f32 %v1554_v13, %v3812_v2 }
 0x60e   : > { %v1558_v22 = vmul.f32 0.5, %v1557_v17 }
 0x60f   : > { %v1591_v42 = vmul.f32 %v3833_v32, %v1580_v16 }
 0x610   : > { %v1559_v24 = vsub.f32 1.5, %v1558_v22 }
 0x611   : > { %v2795_v26 = vpop.eup %2794  ;;  %v1602_v15 = vadd.f32 %v3839_v23, %v1591_v42 }
 0x612   : > { %v1560_v25 = vmul.f32 %v2793_v8, %v1559_v24  ;;  %v1566_v33 = vmul.f32 %v2795_v26, %v1494_v10  ;;  %vm1572_vm15 = vweird.f32 %v2795_v26 }
 0x613   : > { %v2510_v29 = vpack.c.bf16 %v1602_v15, %v1601_v27  ;;  %vm1573_vm1 = vmor %vm1571_vm0, %vm1572_vm15 }
 0x614   : > { %v1567_v56 = vmul.f32 %v2795_v26, %v1566_v33  ;;  %v1564_v34 = vsel %vm1563_vm14, %v2793_v8, %v1560_v25 }
 0x615   : > { %2518 = vst [vmem:[#allocation4 + $0x10] sm:$0xff] %v2510_v29   ;;  %v1581_v36 = vmul.f32 %v1564_v34, %v3817_v49 }
 0x616   : > { %v1568_v2 = vmul.f32 0.5, %v1567_v56 }
 0x617   : > { %v1592_v40 = vmul.f32 %v3833_v32, %v1581_v36 }
 0x618   : > { %v1569_v35 = vsub.f32 1.5, %v1568_v2 }
 0x619   : > { %v1603_v46 = vadd.f32 %v3839_v23, %v1592_v40 }
 0x61a   : > { %v1570_v43 = vmul.f32 %v2795_v26, %v1569_v35 }
 0x61c   : > { %v1574_v39 = vsel %vm1573_vm1, %v2795_v26, %v1570_v43 }
 0x61d   : > { %v1582_v28 = vmul.f32 %v1574_v39, %v3822_v52 }
 0x61f   : > { %v1593_v44 = vmul.f32 %v3833_v32, %v1582_v28 }
 0x621   : > { %v1604_v19 = vadd.f32 %v3839_v23, %v1593_v44 }
 0x623   : > { %v2515_v37 = vpack.c.bf16 %v1604_v19, %v1603_v46 }
 0x625   : > { %2519 = vst [vmem:[#allocation4 + $0x8] sm:$0xff] %v2515_v37  }
 0x626 PF: > { %v2487_v49 = vld [vmem:[%s3536_s15 + $0x38] sm:$0xff]  ;;  %v2486_v52 = vld [vmem:[%s3536_s15 + $0x30] sm:$0xff]  ;;  %v2485_v32 = vld [vmem:[%s3536_s15 + $0x28] sm:$0xff] }
 0x627   : > { %1729 = vmatpush.bf16.msra.mxu0 %v2487_v49  ;;  %2536 = vmatpush.bf16.msra.mxu2 %v2487_v49  ;;  %v2484_v23 = vld [vmem:[%s3536_s15 + $0x20] sm:$0xff]  ;;  %v2483_v47 = vld [vmem:[%s3536_s15 + $0x18] sm:$0xff]  ;;  %v2482_v48 = vld [vmem:[%s3536_s15 + $0x10] sm:$0xff] }
 0x628   : > { %v2481_v50 = vld [vmem:[%s3536_s15 + $0x8] sm:$0xff]  ;;  %v2480_v31 = vld [vmem:[%s3536_s15] sm:$0xff]  ;;  %v2477_v53 = vld [vmem:[#allocation4 + $0x18] sm:$0xff]  ;;  %s4041_s15 = sld [smem:[#allocation27_spill]] }
 0x629   : > { %v2476_v51 = vld [vmem:[#allocation4] sm:$0xff]  ;;  %v2478_v18 = vld [vmem:[#allocation4 + $0x10] sm:$0xff] }
 0x62a   : > { %v2495_v54 = vld [vmem:[%s3550_s23 + $0x38] sm:$0xff]  ;;  %v2494_v59 = vld [vmem:[%s3550_s23 + $0x30] sm:$0xff]  ;;  %v2493_v60 = vld [vmem:[%s3550_s23 + $0x28] sm:$0xff] }
 0x62b   : > { %1730 = vmatpush.bf16.msra.mxu0 %v2486_v52  ;;  %2537 = vmatpush.bf16.msra.mxu2 %v2486_v52  ;;  %v2492_v61 = vld [vmem:[%s3550_s23 + $0x20] sm:$0xff]  ;;  %v2491_v21 = vld [vmem:[%s3550_s23 + $0x18] sm:$0xff]  ;;  %v2490_v62 = vld [vmem:[%s3550_s23 + $0x10] sm:$0xff] }
 0x62c   : > { %v2479_v20 = vld [vmem:[#allocation4 + $0x8] sm:$0xff]  ;;  %1906 = vmatpush.bf16.msra.mxu1 %v2495_v54  ;;  %2544 = vmatpush.bf16.msra.mxu3 %v2495_v54  ;;  %v2804_v30 = vld [vmem:[%s640_s11] ss:$0 sm:$0xff] }
 0x62d   : > { %v2489_v55 = vld [vmem:[%s3550_s23 + $0x8] sm:$0xff]  ;;  %v2488_v0 = vld [vmem:[%s3550_s23] sm:$0xff] }
 0x62e   : > { %p2436_p9 = scmp.ne.s32.totalorder %s4041_s15, 1 }
 0x62f   : > { %1731 = vmatpush.bf16.msra.mxu0 %v2485_v32  ;;  %2538 = vmatpush.bf16.msra.mxu2 %v2485_v32  ;;  %s4042_s3 = sld [smem:[#allocation46_spill]] (!%p2436_p9) }
 0x630   : > { %1907 = vmatpush.bf16.msra.mxu1 %v2494_v59  ;;  %2545 = vmatpush.bf16.msra.mxu3 %v2494_v59 }
 0x633   : > { %1732 = vmatpush.bf16.msra.mxu0 %v2484_v23  ;;  %2539 = vmatpush.bf16.msra.mxu2 %v2484_v23 }
 0x634   : > { %1908 = vmatpush.bf16.msra.mxu1 %v2493_v60  ;;  %2546 = vmatpush.bf16.msra.mxu3 %v2493_v60 }
 0x637   : > { %1733 = vmatpush.bf16.msra.mxu0 %v2483_v47  ;;  %2540 = vmatpush.bf16.msra.mxu2 %v2483_v47 }
 0x638   : > { %1909 = vmatpush.bf16.msra.mxu1 %v2492_v61  ;;  %2547 = vmatpush.bf16.msra.mxu3 %v2492_v61 }
 0x63b   : > { %1734 = vmatpush.bf16.msra.mxu0 %v2482_v48  ;;  %2541 = vmatpush.bf16.msra.mxu2 %v2482_v48 }
 0x63c   : > { %1910 = vmatpush.bf16.msra.mxu1 %v2491_v21  ;;  %2548 = vmatpush.bf16.msra.mxu3 %v2491_v21 }
 0x63f   : > { %1735 = vmatpush.bf16.msra.mxu0 %v2481_v50  ;;  %2542 = vmatpush.bf16.msra.mxu2 %v2481_v50 }
 0x640   : > { %1911 = vmatpush.bf16.msra.mxu1 %v2490_v62  ;;  %2549 = vmatpush.bf16.msra.mxu3 %v2490_v62 }
 0x643   : > { %1736 = vmatpush.bf16.msra.mxu0 %v2480_v31  ;;  %2543 = vmatpush.bf16.msra.mxu2 %v2480_v31 }
 0x644   : > { %1912 = vmatpush.bf16.msra.mxu1 %v2489_v55  ;;  %2550 = vmatpush.bf16.msra.mxu3 %v2489_v55 }
 0x646   : > { %1737 = vmatmul.bf16.vlgmr.msra.gmra.mxu0 %v2476_v51  ;;  %1747 = vmatmul.bf16.vlgmr.msra.gmra.mxu2 %v2478_v18 }
 0x648   : > { %1913 = vmatpush.bf16.msra.mxu1 %v2488_v0  ;;  %2551 = vmatpush.bf16.msra.mxu3 %v2488_v0 }
 0x656   : > { %1742 = vmatmul.bf16.gmra.mxu0 %v2477_v53  ;;  %1752 = vmatmul.bf16.gmra.mxu2 %v2479_v20 }
 0x6c3   : > { %v1738_v63 = vpop.f32.mrf.mxu0 }
 0x6c4   : > { %v1739_v41 = vadd.f32 %v2804_v30, %v1738_v63 }
 0x6c6   : > { %v1766_v45 = vmul.f32 0.044715, %v1739_v41  ;;  %v1758_v49 = vmul.f32 0.5, %v1739_v41 }
 0x6c8   : > { %v1774_v1 = vmul.f32 %v1766_v45, %v1739_v41 }
 0x6c9   : > { %v1748_v4 = vpop.f32.mrf.mxu2 }
 0x6ca   : > { %v1749_v38 = vadd.f32 %v2804_v30, %v1748_v4  ;;  %v1782_v58 = vmul.f32 %v1774_v1, %v1739_v41 }
 0x6cb   : > { %v1740_v57 = vpop.f32.mrf.mxu0 }
 0x6cc   : > { %v1770_v5 = vmul.f32 0.044715, %v1749_v38  ;;  %v1741_v6 = vadd.f32 %v2804_v30, %v1740_v57  ;;  %v1790_v7 = vadd.f32 %v1782_v58, %v1739_v41  ;;  %v1762_v0 = vmul.f32 0.5, %v1749_v38 }
 0x6ce   : > { %v1767_v3 = vmul.f32 0.044715, %v1741_v6  ;;  %v1778_v8 = vmul.f32 %v1770_v5, %v1749_v38  ;;  %v1798_v10 = vmul.f32 0.7978846, %v1790_v7  ;;  %v1759_v52 = vmul.f32 0.5, %v1741_v6 }
 0x6d0   : > { %v1775_v9 = vmul.f32 %v1767_v3, %v1741_v6  ;;  %v1786_v11 = vmul.f32 %v1778_v8, %v1749_v38  ;;  %2805 = vtanh.f32 %v1798_v10 }
 0x6d1   : > { %v1750_v12 = vpop.f32.mrf.mxu2 }
 0x6d2   : > { %v1751_v13 = vadd.f32 %v2804_v30, %v1750_v12  ;;  %v1783_v17 = vmul.f32 %v1775_v9, %v1741_v6  ;;  %v1794_v14 = vadd.f32 %v1786_v11, %v1749_v38 }
 0x6d3   : > { %v1743_v16 = vpop.f32.mrf.mxu0 }
 0x6d4   : > { %v1771_v22 = vmul.f32 0.044715, %v1751_v13  ;;  %v3889_v42 = vadd.f32 %v2804_v30, %v1743_v16  ;;  %v1791_v24 = vadd.f32 %v1783_v17, %v1741_v6  ;;  %v1802_v25 = vmul.f32 0.7978846, %v1794_v14 }
 0x6d5   : > { %v1763_v63 = vmul.f32 0.5, %v1751_v13 }
 0x6d6   : > { %v1768_v26 = vmul.f32 0.044715, %v3889_v42  ;;  %v1799_v27 = vmul.f32 0.7978846, %v1791_v24  ;;  %v1779_v15 = vmul.f32 %v1771_v22, %v1751_v13  ;;  %v2806_v34 = vpop.eup %2805  ;;  %v1760_v38 = vmul.f32 0.5, %v3889_v42 }
 0x6d7   : > { %v1814_v46 = vadd.f32 1.0, %v2806_v34 }
 0x6d8   : > { %2807 = vtanh.f32 %v1799_v27  ;;  %v1787_v33 = vmul.f32 %v1779_v15, %v1751_v13  ;;  %v1776_v29 = vmul.f32 %v1768_v26, %v3889_v42 }
 0x6d9   : > { %v1753_v56 = vpop.f32.mrf.mxu2  ;;  %2809 = vtanh.f32 %v1802_v25  ;;  %v1822_v51 = vmul.f32 %v1814_v46, %v1758_v49  ;;  %v1835_v46 = vld [vmem:[#allocation5 + $0x30] sm:$0xff]  ;;  %v1833_v49 = vld [vmem:[#allocation5 + $0x18] sm:$0xff] }
 0x6da   : > { %v1754_v2 = vadd.f32 %v2804_v30, %v1753_v56  ;;  %v1795_v35 = vadd.f32 %v1787_v33, %v1751_v13  ;;  %v1784_v36 = vmul.f32 %v1776_v29, %v3889_v42  ;;  %v1830_v29 = vld [vmem:[#allocation5 + $0x8] sm:$0xff] }
 0x6db   : > { %v1745_v43 = vpop.f32.mrf.mxu0 }
 0x6dc   : > { %v1772_v39 = vmul.f32 0.044715, %v1754_v2  ;;  %v1746_v40 = vadd.f32 %v2804_v30, %v1745_v43  ;;  %v1803_v28 = vmul.f32 0.7978846, %v1795_v35  ;;  %v1792_v44 = vadd.f32 %v1784_v36, %v3889_v42  ;;  %v1831_v42 = vld [vmem:[#allocation5 + $0x10] sm:$0xff]  ;;  %v1834_v43 = vld [vmem:[#allocation5 + $0x28] sm:$0xff] }
 0x6dd   : > { %v1764_v24 = vmul.f32 0.5, %v1754_v2 }
 0x6de   : > { %v2808_v19 = vpop.eup %2807  ;;  %v1769_v37 = vmul.f32 0.044715, %v1746_v40  ;;  %2811 = vtanh.f32 %v1803_v28  ;;  %v1780_v23 = vmul.f32 %v1772_v39, %v1754_v2  ;;  %v1800_v50 = vmul.f32 0.7978846, %v1792_v44  ;;  %v1832_v28 = vld [vmem:[#allocation5] sm:$0xff] }
 0x6df   : > { %v1815_v32 = vadd.f32 1.0, %v2808_v19  ;;  %v2810_v47 = vpop.eup %2809  ;;  %v1761_v10 = vmul.f32 0.5, %v1746_v40 }
 0x6e0   : > { %v1777_v48 = vmul.f32 %v1769_v37, %v1746_v40  ;;  %v1788_v53 = vmul.f32 %v1780_v23, %v1754_v2  ;;  %v1818_v60 = vadd.f32 1.0, %v2810_v47  ;;  %2813 = vtanh.f32 %v1800_v50  ;;  %v1836_v23 = vld [vmem:[#allocation5 + $0x20] sm:$0xff]  ;;  %v1837_v50 = vld [vmem:[#allocation5 + $0x38] sm:$0xff] }
 0x6e1   : > { %v1755_v31 = vpop.f32.mrf.mxu2  ;;  %v1823_v18 = vmul.f32 %v1815_v32, %v1759_v52 }
 0x6e2   : > { %v1756_v20 = vadd.f32 %v2804_v30, %v1755_v31  ;;  %v1785_v54 = vmul.f32 %v1777_v48, %v1746_v40  ;;  %v1796_v61 = vadd.f32 %v1788_v53, %v1754_v2  ;;  %v1826_v58 = vmul.f32 %v1818_v60, %v1762_v0 }
 0x6e3   : > { %v1838_v59 = vpack.c.bf16 %v1823_v18, %v1822_v51 }
 0x6e4   : > { %v2812_v21 = vpop.eup %2811  ;;  %v1773_v62 = vmul.f32 0.044715, %v1756_v20  ;;  %v1793_v55 = vadd.f32 %v1785_v54, %v1746_v40  ;;  %v1804_v4 = vmul.f32 0.7978846, %v1796_v61  ;;  %v1765_v26 = vmul.f32 0.5, %v1756_v20 }
 0x6e5   : > { %1914 = vmatmul.bf16.vlgmr.msra.gmra.mxu1 %v1838_v59  ;;  %v1819_v41 = vadd.f32 1.0, %v2812_v21 }
 0x6e6   : > { %v1801_v45 = vmul.f32 0.7978846, %v1793_v55  ;;  %v1781_v1 = vmul.f32 %v1773_v62, %v1756_v20  ;;  %v2814_v6 = vpop.eup %2813 }
 0x6e7   : > { %v1827_v57 = vmul.f32 %v1819_v41, %v1763_v63  ;;  %v1816_v8 = vadd.f32 1.0, %v2814_v6 }
 0x6e8   : > { %2815 = vtanh.f32 %v1801_v45  ;;  %v1789_v5 = vmul.f32 %v1781_v1, %v1756_v20 }
 0x6e9   : > { %v1840_v30 = vpack.c.bf16 %v1827_v57, %v1826_v58  ;;  %2817 = vtanh.f32 %v1804_v4  ;;  %v1824_v13 = vmul.f32 %v1816_v8, %v1760_v38 }
 0x6ea   : > { %v1797_v7 = vadd.f32 %v1789_v5, %v1756_v20 }
 0x6eb   : > { %1924 = vmatmul.bf16.vlgmr.msra.gmra.mxu3 %v1840_v30 }
 0x6ec   : > { %v1805_v3 = vmul.f32 0.7978846, %v1797_v7 }
 0x6ee   : > { %v2816_v9 = vpop.eup %2815  ;;  %2819 = vtanh.f32 %v1805_v3 }
 0x6ef   : > { %v1817_v11 = vadd.f32 1.0, %v2816_v9  ;;  %v2818_v12 = vpop.eup %2817 }
 0x6f0   : > { %v1820_v16 = vadd.f32 1.0, %v2818_v12 }
 0x6f1   : > { %v1825_v17 = vmul.f32 %v1817_v11, %v1761_v10 }
 0x6f2   : > { %v1828_v15 = vmul.f32 %v1820_v16, %v1764_v24 }
 0x6f3   : > { %v1839_v14 = vpack.c.bf16 %v1825_v17, %v1824_v13 }
 0x6f4   : > { %v2820_v22 = vpop.eup %2819 }
 0x6f5   : > { %1919 = vmatmul.bf16.gmra.mxu1 %v1839_v14  ;;  %v1821_v27 = vadd.f32 1.0, %v2820_v22 }
 0x6f7   : > { %v1829_v25 = vmul.f32 %v1821_v27, %v1765_v26 }
 0x6f9   : > { %v1841_v33 = vpack.c.bf16 %v1829_v25, %v1828_v15 }
 0x6fb   : > { %1929 = vmatmul.bf16.gmra.mxu3 %v1841_v33 }
 0x762   : > { %v1915_v56 = vpop.f32.mrf.mxu1 }
 0x763   : > { %v1935_v34 = vadd.f32 %v1915_v56, %v1830_v29 }
 0x765   : > { %1943 = vst [vmem:[#allocation5 + $0x8] sm:$0xff] %v1935_v34 }
 0x76a   : > { %v1917_v35 = vpop.f32.mrf.mxu1 }
 0x76b   : > { %v1936_v36 = vadd.f32 %v1917_v35, %v1831_v42 }
 0x76d   : > { %1944 = vst [vmem:[#allocation5 + $0x10] sm:$0xff] %v1936_v36 }
 0x76e   : > { %v1925_v39 = vpop.f32.mrf.mxu3 }
 0x76f   : > { %v1939_v40 = vadd.f32 %v1925_v39, %v1834_v43 }
 0x771   : > { %1947 = vst [vmem:[#allocation5 + $0x28] sm:$0xff] %v1939_v40 }
 0x772   : > { %v1920_v2 = vpop.f32.mrf.mxu1 }
 0x773   : > { %v1937_v44 = vadd.f32 %v1920_v2, %v1832_v28 }
 0x775   : > { %1945 = vst [vmem:[#allocation5] sm:$0xff] %v1937_v44 }
 0x776   : > { %v1927_v19 = vpop.f32.mrf.mxu3 }
 0x777   : > { %v1940_v37 = vadd.f32 %v1927_v19, %v1835_v46 }
 0x779   : > { %1948 = vst [vmem:[#allocation5 + $0x30] sm:$0xff] %v1940_v37 }
 0x77a   : > { %v1922_v52 = vpop.f32.mrf.mxu1 }
 0x77b   : > { %v1938_v32 = vadd.f32 %v1922_v52, %v1833_v49 }
 0x77d   : > { %1946 = vst [vmem:[#allocation5 + $0x18] sm:$0xff] %v1938_v32 }
 0x77e   : > { %v1930_v47 = vpop.f32.mrf.mxu3 }
 0x77f   : > { %v1941_v48 = vadd.f32 %v1930_v47, %v1836_v23 }
 0x781   : > { %1949 = vst [vmem:[#allocation5 + $0x20] sm:$0xff] %v1941_v48 }
 0x785   : > { %1954 = sbr.rel (%p2436_p9) target bundleno = 1943 (0x797), region = 112 }
 0x786   : > { %v1932_v31 = vpop.f32.mrf.mxu3 }
 0x787   : > { %v1942_v51 = vadd.f32 %v1932_v31, %v1837_v50 }
 0x789   : > { %1950 = vst [vmem:[#allocation5 + $0x38] sm:$0xff] %v1942_v51 }
 0x78a   : > { %v1955_v18 = vld [vmem:[#allocation5 + $0x8] sm:$0xff]  ;;  %v2821_v53 = vld [vmem:[%s4042_s3] ss:$0 sm:$0xff]  ;;  %v1975_v20 = vld [vmem:[#allocation3 + $0x30] sm:$0xff] }
 0x78b   : > { %v1956_v54 = vld [vmem:[#allocation5 + $0x10] sm:$0xff]  ;;  %v1976_v59 = vld [vmem:[#allocation3] sm:$0xff]  ;;  %v1967_v60 = vadd.f32 %v2821_v53, %v1955_v18  ;;  %v1977_v62 = vld [vmem:[#allocation3 + $0x18] sm:$0xff] }
 0x78c   : > { %v1968_v61 = vadd.f32 %v2821_v53, %v1956_v54  ;;  %v1957_v21 = vld [vmem:[#allocation5] sm:$0xff]  ;;  %v1958_v55 = vld [vmem:[#allocation5 + $0x18] sm:$0xff]  ;;  %v1978_v41 = vld [vmem:[#allocation3 + $0x10] sm:$0xff] }
 0x78d   : > { %v1969_v0 = vadd.f32 %v2821_v53, %v1957_v21  ;;  %v1970_v63 = vadd.f32 %v2821_v53, %v1958_v55  ;;  %v1959_v45 = vld [vmem:[#allocation5 + $0x28] sm:$0xff]  ;;  %v1983_v4 = vadd.f32 %v1975_v20, %v1967_v60  ;;  %v1960_v5 = vld [vmem:[#allocation5 + $0x30] sm:$0xff]  ;;  %v1980_v30 = vld [vmem:[#allocation3 + $0x20] sm:$0xff] }
 0x78e   : > { %v1979_v1 = vld [vmem:[#allocation3 + $0x8] sm:$0xff]  ;;  %v1984_v58 = vadd.f32 %v1976_v59, %v1968_v61  ;;  %v1971_v57 = vadd.f32 %v2821_v53, %v1959_v45  ;;  %v1961_v6 = vld [vmem:[#allocation5 + $0x20] sm:$0xff]  ;;  %v1972_v8 = vadd.f32 %v2821_v53, %v1960_v5  ;;  %v1982_v13 = vld [vmem:[#allocation3 + $0x38] sm:$0xff] }
 0x78f   : > { %v1985_v7 = vadd.f32 %v1977_v62, %v1969_v0  ;;  %v1986_v3 = vadd.f32 %v1978_v41, %v1970_v63  ;;  %v1973_v9 = vadd.f32 %v2821_v53, %v1961_v6  ;;  %v1981_v38 = vld [vmem:[#allocation3 + $0x28] sm:$0xff]  ;;  %1991 = vst [vmem:[%s3552_s12] sm:$0xff] %v1983_v4 }
 0x790   : > { %v1962_v10 = vld [vmem:[#allocation5 + $0x38] sm:$0xff]  ;;  %v1987_v11 = vadd.f32 %v1979_v1, %v1971_v57  ;;  %1992 = vst [vmem:[%s3552_s12 + $0x8] sm:$0xff] %v1984_v58  ;;  %v1988_v17 = vadd.f32 %v1980_v30, %v1972_v8 }
 0x791   : > { %v1974_v12 = vadd.f32 %v2821_v53, %v1962_v10  ;;  %1993 = vst [vmem:[%s3552_s12 + $0x10] sm:$0xff] %v1985_v7  ;;  %v1989_v14 = vadd.f32 %v1981_v38, %v1973_v9 }
 0x792   : > { %1994 = vst [vmem:[%s3552_s12 + $0x18] sm:$0xff] %v1986_v3 }
 0x793   : > { %v1990_v16 = vadd.f32 %v1982_v13, %v1974_v12  ;;  %1995 = vst [vmem:[%s3552_s12 + $0x20] sm:$0xff] %v1987_v11 }
 0x794   : > { %1996 = vst [vmem:[%s3552_s12 + $0x28] sm:$0xff] %v1988_v17 }
 0x795   : > { %1997 = vst [vmem:[%s3552_s12 + $0x30] sm:$0xff] %v1989_v14 }
 0x796   : > { %1998 = vst [vmem:[%s3552_s12 + $0x38] sm:$0xff] %v1990_v16 }
 0x797 PF: > { %s4043_s19 = sld [smem:[#allocation28_spill]]  ;;  %s2012_s17 = sshll.u32 %s3552_s12, 4  ;;  %s2013_s17 = int_to_ptr.vmem [resolvable:$true] %s2012_s17 }
 0x798   : > { %s4045_s25 = sld [smem:[#allocation47_spill]]  ;;  %s2000_s9 = scalar_lea.sflag [#allocation8], %s534_s8 }
 0x79d   : > { %s2496_s11 = sshll.u32 %s4043_s19, 6 }
 0x79e   : > { %s4046_s0 = smov %s4045_s25  ;;  %s2011_s4 = scalar_lea.hbm %s4045_s25, %s2496_s11 }
 0x79f   : > { %s2014_s2 = sshll.u32 %s2011_s4, 4  ;;  %s3082_s14 = scalar_lea.hbm %s4046_s0, 128  ;;  %s2015_s2 = int_to_ptr.hbm [resolvable:$true] %s2014_s2 }
 0x7a0   : > { %s3076_s20 = sshra.s32 %s2015_s2, 4  ;;  %s3077_s20 = int_to_ptr.hbm [resolvable:$true] %s3076_s20 }
 0x7a1   : > { %s3078_s7 = scalar_lea.hbm %s3077_s20, 64  ;;  %p3083_p11 = scmp.lt.s32.totalorder %s3077_s20, %s4046_s0 }
 0x7a2   : > { %p3079_p0 = scmp.ne.s32.totalorder %s3077_s20, %s3078_s7  ;;  %p3084_p12 = scmp.lt.s32.totalorder %s3082_s14, %s3078_s7 }
 0x7a4   : > { %p3080_p7 = pnand %p3079_p0, %p3390_p10  ;;  %p3085_p1 = por %p3084_p12, %p3083_p11 }
 0x7a6   : > { %p3081_p3 = pneg %p3080_p7 }
 0x7a8   : > { %p3086_p4 = pnand %p3085_p1, %p3081_p3 }
 0x7aa   : > { %3089 = shalt.err (!%p3086_p4)
}
 0x7ab   : > { %s3215_s8 = smov 128   ;;  %s3216_s12 = smov 8  }
 0x7ac   : > { %2578 = dma.vmem_to_hbm [thread:$0]  (%p3390_p10), %s2013_s17, 1024, %s2015_s2, %s2000_s9, %s3215_s8, %s3215_s8, %s3216_s12  }
 0x7ad PF: > { %p2621_p5 = scmp.ge.s32.totalorder %s3200_s18, 2  ;;  %s2029_s3 = sand.u32 1, %s3172_s28  }
 0x7ae   : > { %s2030_s19 = scalar_lea.sflag [#allocation8], %s2029_s3 }
 0x7af   : > { %p2607_p2 = pnand %p2621_p5, %p3400_p13 }
 0x7b1   : > { %p2608_p8 = pneg %p2607_p2 }
 0x7b3   : > { %3155 = dma.done.wait (%p2608_p8), %s2030_s19, 1024  }
 0x7b4   : > { %3157 = vsyncadd (%p2608_p8), %s2030_s19, 4294966272  ;;  %s32_s18 = sadd.s32 1, %s3200_s18   ;;  %s4048_s10 = sld [smem:[#allocation26_spill]] }
 0x7b5   : > { %p29_p6 = scmp.ge.s32.totalorder %s32_s18, 6   ;;  %s4049_s11 = sld [smem:[#allocation34_spill]] }
 0x7b6   : > { %s4050_s15 = sld [smem:[#allocation29_spill]]  ;;  %s4053_s25 = smov %s3164_s26 }
 0x7b7   : > { %s4051_s23 = sld [smem:[#allocation30_spill]]  ;;  %s4054_s26 = smov %s3168_s27 }
 0x7b8   : > { %s4052_s17 = sld [smem:[#allocation31_spill]]  ;;  %s4055_s27 = smov %s3448_s30 }
 0x7b9   : > { %s4056_s28 = smov %s3176_s29  ;;  %s4059_s14 = smov %s3192_s16 }
 0x7ba   : > { %s4057_s29 = smov %s4048_s10  ;;  %31 = sbr.rel (!%p29_p6) target bundleno = 25 (0x19), region = 170 }
 0x7bb   : > { %s4058_s30 = smov %s4049_s11 }
 0x7bd   : > { %s4060_s16 = smov %s4051_s23 }
 0x7bf   :  { %2036 = vsyncpa [#allocation7], 1 }
 0x7c0   :  { %2038 = vsyncpa [#allocation7 + $0x1], 1 }
 0x7c1   :  { %2039 = vsyncpa [#allocation10], 1 }
 0x7c2   :  { %2040 = vsyncpa [#allocation13], 1 }
 0x7c3   :  { %2041 = vsyncpa [#allocation16], 1 }
 0x7c4   :  { %2042 = vsyncpa [#allocation8], 1 }
 0x7c5   :  { %2044 = vsyncpa [#allocation8 + $0x1], 1 }

</bundles_post_ra>
